<compile_context>
chip_gen: v7x
topology: tpu7x:2x2x1
jax: 0.10.0
libtpu: 0.0.40
codegen_flags: <defaults>
</compile_context>

<pallas_src>
import functools

import jax
import jax.numpy as jnp
from jax.experimental import pallas as pl
from jax.experimental.pallas import tpu as pltpu

architecture_config = [(7, 64, 2, 3), 'M', (3, 192, 1, 1), 'M', (1, 128, 1, 0),
                       (3, 256, 1, 1), (1, 256, 1, 0), (3, 512, 1, 1), 'M',
                       [(1, 256, 1, 0), (3, 512, 1, 1), 4], (1, 512, 1, 0),
                       (3, 1024, 1, 1), 'M',
                       [(1, 512, 1, 0), (3, 1024, 1, 1), 2],
                       (3, 1024, 1, 1), (3, 1024, 2, 1), (3, 1024, 1, 1),
                       (3, 1024, 1, 1)]

_VMEM_LIMIT = 40 * 1024 * 1024          # fits v5e/v6e (128 MiB) and v7x (64 MiB)
_W_BLOCK_BUDGET = 12 * 1024 * 1024      # double-buffered weight-block budget


def _round_up(x, m):
    return (x + m - 1) // m * m


# ----------------------------------------------------------------------------
# Tile selection
# ----------------------------------------------------------------------------
def _pick_tm(M):
    """Largest multiple of 8 <= 512 that divides M (avoids any M padding)."""
    for t in range(512, 0, -8):
        if M % t == 0:
            return t
    return M if M <= 1024 else 256      # full-dim block, or (rare) padded M


def _pick_tn(Np):
    for t in (512, 256, 128):
        if Np % t == 0:
            return t
    return Np


def _pick_tk(Kp, tm, tn):
    def fits(tk):
        # bf16 lhs + rhs tiles, double-buffered
        return 2 * 2 * tk * (tm + tn) <= 2 * _W_BLOCK_BUDGET
    if fits(Kp):
        return Kp                        # single K step: no accumulator needed
    best = 128
    t = 128
    while t <= Kp:
        if Kp % t == 0 and fits(t):
            best = t
        t += 128
    return best


# ----------------------------------------------------------------------------
# Fused GEMM + scale/shift (+ optional LeakyReLU), bf16 MXU / f32 accumulation
# ----------------------------------------------------------------------------
def _gemm_kernel(x_ref, w_ref, scale_ref, shift_ref, o_ref, *scratch,
                 apply_act, single_k):
    def epilogue(acc):
        y = acc * scale_ref[...] + shift_ref[...]
        if apply_act:
            y = jnp.maximum(y, 0.1 * y)          # LeakyReLU(0.1), single VPU max
        return y.astype(o_ref.dtype)

    if single_k:
        o_ref[...] = epilogue(jnp.dot(x_ref[...], w_ref[...],
                                      preferred_element_type=jnp.float32))
    else:
        acc_ref = scratch[0]
        kk = pl.program_id(2)

        @pl.when(kk == 0)
        def _():
            acc_ref[...] = jnp.zeros_like(acc_ref)

        acc_ref[...] += jnp.dot(x_ref[...], w_ref[...],
                                preferred_element_type=jnp.float32)

        @pl.when(kk == pl.num_programs(2) - 1)
        def _():
            o_ref[...] = epilogue(acc_ref[...])


def gemm_scale_shift_act(x, wp, sp, bp, *, apply_act, out_dtype, n_valid=None):
    """act(scale * (x @ w) + shift). wp/sp/bp are pre-padded (Kp,Np)/(1,Np)."""
    M, K = x.shape
    Kp, Np = wp.shape
    if K != Kp:                                   # safety; never hit in practice
        x = jnp.pad(x, ((0, 0), (0, Kp - K)))
    tm, tn = _pick_tm(M), _pick_tn(Np)
    tk = _pick_tk(Kp, tm, tn)
    Mp = _round_up(M, tm)
    if Mp != M:
        x = jnp.pad(x, ((0, Mp - M), (0, 0)))
    x = x.astype(jnp.bfloat16)
    nk = Kp // tk
    kernel = functools.partial(_gemm_kernel, apply_act=apply_act,
                               single_k=(nk == 1))
    scratch = [] if nk == 1 else [pltpu.VMEM((tm, tn), jnp.float32)]

    out = pl.pallas_call(
        kernel,
        out_shape=jax.ShapeDtypeStruct((Mp, Np), out_dtype),
        grid_spec=pltpu.PrefetchScalarGridSpec(
            num_scalar_prefetch=0,
            grid=(Mp // tm, Np // tn, nk),
            in_specs=[pl.BlockSpec((tm, tk), lambda i, j, k: (i, k)),
                      pl.BlockSpec((tk, tn), lambda i, j, k: (k, j)),
                      pl.BlockSpec((1, tn), lambda i, j, k: (0, j)),
                      pl.BlockSpec((1, tn), lambda i, j, k: (0, j))],
            out_specs=pl.BlockSpec((tm, tn), lambda i, j, k: (i, j)),
            scratch_shapes=scratch),
        compiler_params=pltpu.CompilerParams(
            dimension_semantics=("parallel", "parallel", "arbitrary"),
            vmem_limit_bytes=_VMEM_LIMIT),
    )(x, wp, sp, bp)
    if Mp != M:
        out = out[:M]
    if n_valid is not None and n_valid != Np:
        out = out[:, :n_valid]
    return out


# ----------------------------------------------------------------------------
# Direct (im2col-free) kxk stride-1 conv + BN + LeakyReLU
# ----------------------------------------------------------------------------
def _pick_conv_tr(oh, ow):
    """Output-row tile: needs ow % 8 == 0 (lane/sublane-clean in-kernel concat)."""
    if ow % 8 != 0:
        return None
    best = None
    for tr in range(1, oh + 1):
        if oh % tr == 0 and tr * ow <= 640:
            best = tr
    return best


def _direct_conv_kernel(*refs, nrow, k, tr, ow, cin_p, apply_act):
    row_refs = refs[:nrow]                       # nrow = tr + k - 1 input rows
    w_ref, scale_ref, shift_ref, o_ref = refs[nrow:nrow + 4]
    acc = None
    for i in range(k):                           # kernel rows
        for j in range(k):                       # kernel cols
            parts = [row_refs[r + i][j:j + ow, :] for r in range(tr)]
            lhs = parts[0] if tr == 1 else jnp.concatenate(parts, axis=0)
            w_tap = w_ref[(i * k + j) * cin_p:(i * k + j + 1) * cin_p, :]
            d = jnp.dot(lhs, w_tap, preferred_element_type=jnp.float32)
            acc = d if acc is None else acc + d
    y = acc * scale_ref[...] + shift_ref[...]
    if apply_act:
        y = jnp.maximum(y, 0.1 * y)
    o_ref[...] = y.astype(o_ref.dtype)


def direct_conv_bn_lrelu(x, layer, oh, ow, tr):
    n, h, w, cp = x.shape
    k, p, coutp = layer['ksize'], layer['pad'], layer['coutp']
    if p:
        x = jnp.pad(x, ((0, 0), (p, p), (p, p), (0, 0)))
    wp = w + 2 * p
    nrow = tr + k - 1
    tn = _pick_tn(coutp)
    while k * k * cp * tn * 4 > _W_BLOCK_BUDGET and tn > 128:
        tn //= 2

    row_specs = [
        pl.BlockSpec((None, None, wp, cp),
                     lambda jb, nb, hb, r=r: (nb, hb * tr + r, 0, 0))
        for r in range(nrow)]
    in_specs = row_specs + [
        pl.BlockSpec((k * k * cp, tn), lambda jb, nb, hb: (0, jb)),
        pl.BlockSpec((1, tn), lambda jb, nb, hb: (0, jb)),
        pl.BlockSpec((1, tn), lambda jb, nb, hb: (0, jb)),
    ]
    out_specs = pl.BlockSpec((None, tr * ow, tn), lambda jb, nb, hb: (nb, hb, jb))
    kernel = functools.partial(_direct_conv_kernel, nrow=nrow, k=k, tr=tr,
                               ow=ow, cin_p=cp, apply_act=True)

    out = pl.pallas_call(
        kernel,
        out_shape=jax.ShapeDtypeStruct((n, oh * ow, coutp), jnp.bfloat16),
        grid_spec=pltpu.PrefetchScalarGridSpec(
            num_scalar_prefetch=0,
            grid=(coutp // tn, n, oh // tr),     # weight re-fetched only per jb
            in_specs=in_specs,
            out_specs=out_specs),
        compiler_params=pltpu.CompilerParams(
            dimension_semantics=("parallel", "parallel", "parallel"),
            vmem_limit_bytes=_VMEM_LIMIT),
    )(*([x] * nrow), layer['wmat'], layer['scale'], layer['shift'])
    return out.reshape(n, oh, ow, coutp)


# ----------------------------------------------------------------------------
# im2col fallback (first 7x7 s=2 conv, the two stride-2 / tiny-spatial 3x3s)
# ----------------------------------------------------------------------------
def _im2col(x, k, s, p, oh, ow, kpad):
    n, h, w, c = x.shape
    if p:
        x = jnp.pad(x, ((0, 0), (p, p), (p, p), (0, 0)))
    m = n * oh * ow
    cols = [x[:, i:i + s * oh:s, j:j + s * ow:s, :].reshape(m, c)
            for i in range(k) for j in range(k)]
    kk = k * k * c
    if kpad > kk:
        cols.append(jnp.zeros((m, kpad - kk), x.dtype))
    return jnp.concatenate(cols, axis=-1)


def conv_bn_lrelu(x, layer):
    n, h, w, cp = x.shape
    k, s, p = layer['ksize'], layer['stride'], layer['pad']
    coutp = layer['coutp']
    oh = (h + 2 * p - k) // s + 1
    ow = (w + 2 * p - k) // s + 1
    if k == 1 and s == 1 and p == 0:             # 1x1 conv: pure GEMM, no im2col
        out = gemm_scale_shift_act(x.reshape(n * oh * ow, cp),
                                   layer['wmat'], layer['scale'],
                                   layer['shift'], apply_act=True,
                                   out_dtype=jnp.bfloat16)
        return out.reshape(n, oh, ow, coutp)
    if s == 1 and cp % 128 == 0:
        tr = _pick_conv_tr(oh, ow)
        if tr is not None:                       # direct conv, no HBM im2col
            return direct_conv_bn_lrelu(x, layer, oh, ow, tr)
    patches = _im2col(x, k, s, p, oh, ow, layer['kp'])
    out = gemm_scale_shift_act(patches, layer['wmat'], layer['scale'],
                               layer['shift'], apply_act=True,
                               out_dtype=jnp.bfloat16)
    return out.reshape(n, oh, ow, coutp)


# ----------------------------------------------------------------------------
# MaxPool2d(kernel=2, stride=2): single-read, lane-dense 4-way max
# ----------------------------------------------------------------------------
def _maxpool_kernel(x_ref, o_ref, *, c):
    m = jnp.maximum(x_ref[:, 0, :, :], x_ref[:, 1, :, :])   # row pair
    o_ref[...] = jnp.maximum(m[:, :, :c], m[:, :, c:])      # column pair (lanes)


def _pick_pool_tr(oh, ow, c):
    best = 1
    for tr in range(1, oh + 1):
        if oh % tr == 0 and tr * ow * c * 8 <= 4 * 1024 * 1024:
            best = tr
    return best


def maxpool2x2(x):
    n, h, w, c = x.shape
    oh, ow = h // 2, w // 2
    if h != 2 * oh or w != 2 * ow:               # torch floor behaviour
        x = x[:, :2 * oh, :2 * ow, :]
    xv = x.reshape(n, oh, 2, ow, 2 * c)          # free (contiguity-preserving)
    tr = _pick_pool_tr(oh, ow, c)
    kernel = functools.partial(_maxpool_kernel, c=c)
    return pl.pallas_call(
        kernel,
        out_shape=jax.ShapeDtypeStruct((n, oh, ow, c), x.dtype),
        grid_spec=pltpu.PrefetchScalarGridSpec(
            num_scalar_prefetch=0,
            grid=(n, oh // tr),
            in_specs=[pl.BlockSpec((None, tr, 2, ow, 2 * c),
                                   lambda i, j: (i, j, 0, 0, 0))],
            out_specs=pl.BlockSpec((None, tr, ow, c),
                                   lambda i, j: (i, j, 0, 0))),
        compiler_params=pltpu.CompilerParams(
            dimension_semantics=("parallel", "parallel"),
            vmem_limit_bytes=_VMEM_LIMIT),
    )(xv)


# ----------------------------------------------------------------------------
# Parameter construction (deterministic, synthetic); weights pre-padded + bf16
# ----------------------------------------------------------------------------
def _fold_conv(w, scale, shift, cin_p):
    """w: (k,k,cin,cout) f32 -> ((k*k*cin_p)_padded, cout_p) bf16 GEMM matrix."""
    k = w.shape[0]
    cin, cout = w.shape[2], w.shape[3]
    cop = _round_up(cout, 128)
    w = jnp.pad(w, ((0, 0), (0, 0), (0, cin_p - cin), (0, cop - cout)))
    wmat = w.reshape(k * k * cin_p, cop)
    kp = _round_up(k * k * cin_p, 128)
    if kp != k * k * cin_p:
        wmat = jnp.pad(wmat, ((0, kp - k * k * cin_p), (0, 0)))
    sp = jnp.pad(scale, (0, cop - cout)).reshape(1, cop).astype(jnp.float32)
    bp = jnp.pad(shift, (0, cop - cout)).reshape(1, cop).astype(jnp.float32)
    return wmat.astype(jnp.bfloat16), sp, bp, kp, cop


def init_yolo_params(key, in_channels=3, split_size=1, num_boxes=2,
                     num_classes=20):
    eps = 1e-5
    ops = []
    cin = in_channels
    for entry in architecture_config:
        if isinstance(entry, tuple):
            k, cout, s, p = entry
            ops.append(('conv', cin, cout, k, s, p))
            cin = cout
        elif isinstance(entry, str):
            ops.append(('pool',))
        else:
            c1, c2, reps = entry
            for _ in range(reps):
                ops.append(('conv', cin, c1[1], c1[0], c1[2], c1[3]))
                ops.append(('conv', c1[1], c2[1], c2[0], c2[2], c2[3]))
                cin = c2[1]

    darknet = []
    cin_p = in_channels                      # runtime (padded) channel count
    for op in ops:
        if op[0] == 'pool':
            darknet.append({'type': 'pool'})
            continue
        _, ci, co, k, s, p = op
        key, k1, k2, k3 = jax.random.split(key, 4)
        fan_in = ci * k * k
        w = jax.random.normal(k1, (k, k, ci, co), jnp.float32) * jnp.sqrt(2.0 / fan_in)
        gamma = 1.0 + 0.1 * jax.random.normal(k2, (co,), jnp.float32)
        beta = 0.1 * jax.random.normal(k3, (co,), jnp.float32)
        running_mean = jnp.zeros((co,), jnp.float32)   # BN eval-mode stats
        running_var = jnp.ones((co,), jnp.float32)
        scale = gamma / jnp.sqrt(running_var + eps)
        shift = beta - running_mean * scale
        wmat, sp, bp, kp, cop = _fold_conv(w, scale, shift, cin_p)
        darknet.append({'type': 'conv', 'wmat': wmat, 'scale': sp, 'shift': bp,
                        'ksize': k, 'stride': s, 'pad': p,
                        'cout': co, 'coutp': cop, 'kp': kp})
        cin_p = cop

    S, B, C = split_size, num_boxes, num_classes
    d_in = 1024 * S * S
    d_out = S * S * (C + B * 5)
    key, k1, k2, k3, k4 = jax.random.split(key, 5)

    def fold_fc(wk, bk, din, dout):
        wf = jax.random.normal(wk, (din, dout), jnp.float32) / jnp.sqrt(float(din))
        bf = 0.01 * jax.random.normal(bk, (dout,), jnp.float32)
        kp = _round_up(din, 128)
        npad = _round_up(dout, 128)
        wmat = jnp.pad(wf, ((0, kp - din), (0, npad - dout))).astype(jnp.bfloat16)
        sp = jnp.pad(jnp.ones((dout,), jnp.float32), (0, npad - dout)).reshape(1, npad)
        bp = jnp.pad(bf, (0, npad - dout)).reshape(1, npad)
        return {'wmat': wmat, 'scale': sp, 'shift': bp, 'n': dout}

    return {'darknet': darknet,
            'fc1': fold_fc(k1, k2, d_in, 4096),
            'fc2': fold_fc(k3, k4, 4096, d_out),
            'feat_channels': 1024}


# ----------------------------------------------------------------------------
# Full YOLOv1 forward
# ----------------------------------------------------------------------------
def yolov1_forward(x_nchw, params):
    x = jnp.transpose(x_nchw, (0, 2, 3, 1)).astype(jnp.bfloat16)   # NCHW -> NHWC
    for layer in params['darknet']:
        if layer['type'] == 'conv':
            x = conv_bn_lrelu(x, layer)
        else:
            x = maxpool2x2(x)
    n = x.shape[0]
    cfeat = params['feat_channels']
    if x.shape[-1] != cfeat:
        x = x[..., :cfeat]
    # match torch nn.Flatten() on an NCHW tensor (channel-major ordering)
    feat = jnp.transpose(x, (0, 3, 1, 2)).reshape(n, -1)
    fc1 = params['fc1']
    h = gemm_scale_shift_act(feat, fc1['wmat'], fc1['scale'], fc1['shift'],
                             apply_act=True, out_dtype=jnp.bfloat16,
                             n_valid=fc1['n'])
    # TODO(synk): nn.Dropout(0.1) is identity in eval mode; training-mode random
    # masking not implemented.
    fc2 = params['fc2']
    out = gemm_scale_shift_act(h, fc2['wmat'], fc2['scale'], fc2['shift'],
                               apply_act=False, out_dtype=jnp.float32,
                               n_valid=fc2['n'])
    return out


if __name__ == "__main__":
    key = jax.random.PRNGKey(0)
    key, pkey, xkey = jax.random.split(key, 3)

    # Small, architecture-consistent shapes: the darknet downsamples by 64x,
    # so a 64x64 input yields a 1x1x1024 feature map -> split_size S = 1.
    batch, in_channels, hw = 2, 3, 64
    split_size, num_boxes, num_classes = 1, 2, 20

    params = init_yolo_params(pkey, in_channels=in_channels,
                              split_size=split_size, num_boxes=num_boxes,
                              num_classes=num_classes)
    x = jax.random.normal(xkey, (batch, in_channels, hw, hw), jnp.float32)

    out = yolov1_forward(x, params)
    out = jax.block_until_ready(out)

    expected = (batch, split_size * split_size * (num_classes + num_boxes * 5))
    assert out.shape == expected, (out.shape, expected)
    assert bool(jnp.all(jnp.isfinite(out)))
    print("KERNEL_OK")
</pallas_src>

<mosaic_0001>
module attributes {stable_mosaic.version = 11 : i64} {
  func.func @_gemm_kernel(%arg0: i32, %arg1: i32, %arg2: i32, %arg3: memref<512x256xbf16, #tpu.memory_space<vmem>>, %arg4: memref<256x128xbf16, #tpu.memory_space<vmem>>, %arg5: memref<1x128xf32, #tpu.memory_space<vmem>>, %arg6: memref<1x128xf32, #tpu.memory_space<vmem>>, %arg7: memref<512x128xbf16, #tpu.memory_space<vmem>>) attributes {dimension_semantics = [#tpu.dimension_semantics<parallel>, #tpu.dimension_semantics<parallel>, #tpu.dimension_semantics<arbitrary>], iteration_bounds = array<i64: 4, 1, 1>, scalar_prefetch = 0 : i64, scratch_operands = 0 : i64, tpu.core_type = #tpu.core_type<tc>, window_params = [{transform_indices = @transform_0, window_bounds = array<i64: 512, 256>}, {transform_indices = @transform_1, window_bounds = array<i64: 256, 128>}, {transform_indices = @transform_2, window_bounds = array<i64: 1, 128>}, {transform_indices = @transform_3, window_bounds = array<i64: 1, 128>}, {transform_indices = @transform_4, window_bounds = array<i64: 512, 128>}]} {
    %c0 = arith.constant 0 : index
    %c0_0 = arith.constant 0 : index
    %0 = vector.load %arg3[%c0, %c0_0] : memref<512x256xbf16, #tpu.memory_space<vmem>>, vector<512x256xbf16>
    %c0_1 = arith.constant 0 : index
    %c0_2 = arith.constant 0 : index
    %1 = vector.load %arg4[%c0_1, %c0_2] : memref<256x128xbf16, #tpu.memory_space<vmem>>, vector<256x128xbf16>
    %cst = arith.constant dense<0.000000e+00> : vector<512x128xf32>
    %2 = tpu.matmul %0, %1, %cst {dimension_numbers = #tpu.dot_dimension_numbers<[1], [0], [0], [1], [0, 0, 1, 1], [], []>} : vector<512x256xbf16>, vector<256x128xbf16>, vector<512x128xf32> -> vector<512x128xf32>
    %c0_3 = arith.constant 0 : index
    %c0_4 = arith.constant 0 : index
    %3 = vector.load %arg5[%c0_3, %c0_4] : memref<1x128xf32, #tpu.memory_space<vmem>>, vector<1x128xf32>
    %4 = vector.broadcast %3 : vector<1x128xf32> to vector<512x128xf32>
    %5 = arith.mulf %2, %4 : vector<512x128xf32>
    %c0_5 = arith.constant 0 : index
    %c0_6 = arith.constant 0 : index
    %6 = vector.load %arg6[%c0_5, %c0_6] : memref<1x128xf32, #tpu.memory_space<vmem>>, vector<1x128xf32>
    %7 = vector.broadcast %6 : vector<1x128xf32> to vector<512x128xf32>
    %8 = arith.addf %5, %7 : vector<512x128xf32>
    %cst_7 = arith.constant 1.000000e-01 : f32
    %9 = vector.broadcast %cst_7 : f32 to vector<512x128xf32>
    %10 = arith.mulf %9, %8 : vector<512x128xf32>
    %11 = arith.maximumf %8, %10 : vector<512x128xf32>
    %12 = arith.truncf %11 : vector<512x128xf32> to vector<512x128xbf16>
    %c0_8 = arith.constant 0 : index
    %c0_9 = arith.constant 0 : index
    %13 = vector.load %arg7[%c0_8, %c0_9] : memref<512x128xbf16, #tpu.memory_space<vmem>>, vector<512x128xbf16>
    tpu.vector_store %arg7[%c0_8, %c0_9], %12 {strides = array<i32>} : memref<512x128xbf16, #tpu.memory_space<vmem>>, vector<512x128xbf16>,
    return
  }
  func.func @transform_0(%arg0: i32, %arg1: i32, %arg2: i32) -> (i32, i32) {
    %c0_i32 = arith.constant 0 : i32
    return %arg0, %arg2 : i32, i32
  }
  func.func @transform_1(%arg0: i32, %arg1: i32, %arg2: i32) -> (i32, i32) {
    %c0_i32 = arith.constant 0 : i32
    return %arg2, %arg1 : i32, i32
  }
  func.func @transform_2(%arg0: i32, %arg1: i32, %arg2: i32) -> (i32, i32) {
    %c0_i32 = arith.constant 0 : i32
    %c0_i32_0 = arith.constant 0 : i32
    return %c0_i32, %arg1 : i32, i32
  }
  func.func @transform_3(%arg0: i32, %arg1: i32, %arg2: i32) -> (i32, i32) {
    %c0_i32 = arith.constant 0 : i32
    %c0_i32_0 = arith.constant 0 : i32
    return %c0_i32, %arg1 : i32, i32
  }
  func.func @transform_4(%arg0: i32, %arg1: i32, %arg2: i32) -> (i32, i32) {
    %c0_i32 = arith.constant 0 : i32
    return %arg0, %arg1 : i32, i32
  }
}

</mosaic_0001>

<bundles_post_ra>
// kernel: tpu_custom_call.1
= control target key start
LH: loop header
LB: loop body
LE: loop exit
PB: predicated region body
PF: predicated region fallthrough
CT: control target
= control target key end

     0   :  { %9 = vsyncpa [#allocation3], 0  ;;  %s3152_s0 = inlined_call_operand.hbm [shape: bf16[2048,256], index: 0, kind: input, shape index: {}]   ;;  %s3153_s1 = inlined_call_operand.hbm [shape: bf16[256,128], index: 1, kind: input, shape index: {}]   ;;  %s3154_s2 = inlined_call_operand.vmem [shape: f32[1,128], index: 2, kind: input, shape index: {}]   ;;  %s3155_s3 = inlined_call_operand.vmem [shape: f32[1,128], index: 3, kind: input, shape index: {}]   ;;  %s3156_s4 = inlined_call_operand.hbm [shape: bf16[2048,128], index: 4, kind: output, shape index: {}]  }
   0x1   :  { %11 = vsyncpa [#allocation3 + $0x1], 0 }
   0x2   :  { %12 = vsyncpa [#allocation6], 0 }
   0x3   :  { %13 = vsyncpa [#allocation4], 0 }
   0x4   :  { %15 = vsyncpa [#allocation4 + $0x1], 0  ;;  %s2663_s15 = smov 0   ;;  %s2665_s16 = smov 0  }
   0x5   :  { %s2667_s17 = smov 0   ;;  %s2669_s18 = smov 0  }
   0x6   :  { %s2671_s19 = smov 0   ;;  %s2673_s20 = smov 0  }
   0x7 LB: > { %s1834_s21 = sadd.s32 4294967295, %s2626_s20   ;;  %s1835_s22 = sadd.s32 4294967294, %s2626_s20   ;;  %s2626_s20 = sphi %s2673_s20, %s21_s20   ;;  %s2622_s19 = sphi %s2671_s19, %s3179_s19   ;;  %s2618_s18 = sphi %s2669_s18, %s3178_s18   ;;  %s2614_s17 = sphi %s2667_s17, %s3177_s17   ;;  %s2610_s16 = sphi %s2665_s16, %s3176_s16   ;;  %s2606_s15 = sphi %s2663_s15, %s3175_s15  }
   0x8   : > { %p62_p0 = scmp.ne.s32.totalorder %s2610_s16, %s2606_s15  ;;  %p2697_p1 = scmp.eq.s32.totalorder %s1834_s21, 0 }
   0x9   : > { %p2701_p2 = scmp.eq.s32.totalorder %s1834_s21, 3  ;;  %p174_p3 = scmp.eq.s32.totalorder %s1835_s22, 3 }
   0xa   : > { %s3161_s23 = scalar_select %p2697_p1, 1, 0 }
   0xb   : > { %s3162_s24 = scalar_select %p2701_p2, 1, 0 }
   0xc   : > { %p2707_p4 = por %p2697_p1, %p62_p0  ;;  %p1836_p5 = scmp.ge.s32.totalorder %s2626_s20, 1 }
   0xd   : > { %p2712_p6 = por %p174_p3, %p62_p0  ;;  %p181_p7 = scmp.lt.s32.totalorder %s2626_s20, 5 }
   0xe   : > { %s3163_s25 = scalar_select %p2707_p4, 1, 0 }
   0xf   : > { %s3164_s26 = scalar_select %p2712_p6, 1, 0 }
  0x10   : > { %p2717_p8 = pnand %p1836_p5, %p181_p7  ;;  %s2628_s28 = smov [#allocation5]  }
  0x11   : > { %s197_s29 = sshll.u32 %s2628_s28, 4  ;;  %s40_s5 = sadd.s32 1, %s2622_s19  ;;  %s198_s29 = int_to_ptr.vmem [resolvable:$true] %s197_s29 }
  0x12   : > { %s3165_s27 = scalar_select %p2717_p8, 1, 0 }
  0x13   : > { %p2298_p9 = pneg %p2717_p8  ;;  %s2482_s8 = scalar_lea.hbm %s3153_s1, 2048 }
  0x14   : > { %p2483_p11 = scmp.ne.s32.totalorder %s3153_s1, %s2482_s8  ;;  %p2489_p3 = scmp.lt.u32.totalorder %s2482_s8, %s3153_s1 }
  0x15   : > { %p2725_p10 = pnand %p2298_p9, %p2697_p1 }
  0x17   : > { %p2484_p12 = pneg %p2725_p10 }
  0x19   : > { %p2485_p13 = pnand %p2484_p12, %p2483_p11 }
  0x1b   : > { %p2486_p0 = pneg %p2485_p13 }
  0x1d   : > { %p2491_p5 = pnand %p2489_p3, %p2486_p0 }
  0x1f   : > { %2494 = shalt.err (!%p2491_p5)
}
  0x20   : > { %s2495_s13 = scalar_lea.vmem %s198_s29, 2048  ;;  %p2503_p1 = scmp.lt.s32.totalorder %s198_s29, %s198_s29 }
  0x21   : > { %p2496_p7 = scmp.ne.s32.totalorder %s198_s29, %s2495_s13  ;;  %p2504_p4 = scmp.lt.s32.totalorder %s2495_s13, %s2495_s13 }
  0x23   : > { %p2498_p9 = pnand %p2496_p7, %p2484_p12  ;;  %p2505_p8 = por %p2504_p4, %p2503_p1 }
  0x25   : > { %p2499_p6 = pneg %p2498_p9 }
  0x27   : > { %p2506_p2 = pnand %p2505_p8, %p2499_p6 }
  0x29   : > { %2509 = shalt.err (!%p2506_p2)
}
  0x2a   : > { %s2629_s14 = smov 64   ;;  %s2630_s21 = smov 4  }
  0x2b   : > { %2301 = dma.hbm_to_vmem [thread:$0]  (!%p2725_p10), %s3153_s1, 2048, %s198_s29, [#allocation6], %s2629_s14, %s2629_s14, %s2630_s21  }
  0x2c   : > { %p42_p1 = scmp.ge.s32.totalorder %s40_s5, 4  ;;  %s49_s6 = sadd.s32 1, %s2614_s17 }
  0x2d   : > { %p56_p2 = scmp.ne.s32.totalorder %s2614_s17, %s2610_s16  ;;  %p57_p4 = scmp.eq.s32.totalorder %s2626_s20, 0 }
  0x2e   : > { %s3181_s5 = smov (%p42_p1, %s40_s5), 0  ;;  %p3168_p8 = scmp.ne.s32.totalorder %s3162_s24, 0 }
  0x2f   : > { %p2752_p6 = por %p57_p4, %p56_p2  ;;  %s44_s30 = ssub.s32 %s2622_s19, %s3181_s5 }
  0x30   : > { %p2758_p11 = por %p3168_p8, %p56_p2  ;;  %p2311_p12 = scmp.lt.s32.totalorder %s2626_s20, 4 }
  0x31   : > { %p47_p10 = scmp.eq.s32.totalorder %s44_s30, 0  ;;  %s223_s29 = sand.u32 1, %s2614_s17  }
  0x32   : > { %s1841_s9 = sshll.u32 %s223_s29, 9  ;;  %s2001_s11 = sshll.u32 %s2622_s19, 13 }
  0x33   : > { %s2767_s10 = scalar_select %p47_p10, %s2614_s17, %s49_s6  }
  0x34   : > { %s2773_s14 = scalar_lea.hbm %s3152_s0, %s2001_s11  ;;  %s227_s24 = scalar_lea.vmem [#allocation2], %s1841_s9 }
  0x35   : > { %s237_s21 = sshll.u32 %s227_s24, 4  ;;  %p2779_p13 = pnand %p2311_p12, %p2752_p6  ;;  %s2775_s21 = int_to_ptr.vmem [resolvable:$true] %s237_s21 }
  0x36   : > { %s2783_s28 = scalar_lea.sflag [#allocation3], %s223_s29  ;;  %s2510_s6 = scalar_lea.hbm %s2773_s14, 8192 }
  0x37   : > { %p2511_p0 = scmp.ne.s32.totalorder %s2773_s14, %s2510_s6  ;;  %p2512_p3 = pneg %p2779_p13 }
  0x38   : > { %s2515_s7 = scalar_lea.hbm %s3152_s0, 32768  ;;  %p2516_p9 = scmp.lt.u32.totalorder %s2773_s14, %s3152_s0 }
  0x39   : > { %p2513_p5 = pnand %p2512_p3, %p2511_p0  ;;  %p2517_p1 = scmp.lt.u32.totalorder %s2515_s7, %s2510_s6 }
  0x3a   : > { %p2519_p4 = scmp.lt.u32.totalorder %s2510_s6, %s2773_s14 }
  0x3b   : > { %p2514_p7 = pneg %p2513_p5  ;;  %p2518_p2 = por %p2517_p1, %p2516_p9 }
  0x3d   : > { %p2520_p6 = por %p2519_p4, %p2518_p2 }
  0x3f   : > { %p2521_p8 = pnand %p2520_p6, %p2514_p7 }
  0x41   : > { %2524 = shalt.err (!%p2521_p8)
}
  0x42   : > { %s2525_s29 = scalar_lea.vmem %s2775_s21, 8192  ;;  %s2631_s13 = smov [#allocation2]  }
  0x43   : > { %p2526_p12 = scmp.ne.s32.totalorder %s2775_s21, %s2525_s29  ;;  %s2530_s24 = sshll.u32 %s2631_s13, 4  ;;  %s2531_s24 = int_to_ptr.vmem [resolvable:$false] %s2530_s24 }
  0x44   : > { %s2532_s30 = scalar_lea.vmem %s2531_s24, 16384  ;;  %p2533_p5 = scmp.lt.s32.totalorder %s2775_s21, %s2531_s24 }
  0x45   : > { %p2528_p10 = pnand %p2526_p12, %p2512_p3  ;;  %p2534_p9 = scmp.lt.s32.totalorder %s2532_s30, %s2525_s29 }
  0x47   : > { %p2529_p0 = pneg %p2528_p10  ;;  %p2535_p1 = por %p2534_p9, %p2533_p5 }
  0x49   : > { %p2536_p2 = pnand %p2535_p1, %p2529_p0 }
  0x4b   : > { %2539 = shalt.err (!%p2536_p2)
}
  0x4c   : > { %s2632_s6 = smov 128   ;;  %s2633_s9 = smov 8  }
  0x4d   : > { %2305 = dma.hbm_to_vmem [thread:$0]  (!%p2779_p13), %s2773_s14, 8192, %s2775_s21, %s2783_s28, %s2632_s6, %s2632_s6, %s2633_s9  }
  0x4e   : > { %p3171_p3 = scmp.ne.s32.totalorder %s3165_s27, 0 }
  0x4f   : > { %s2814_s7 = sand.u32 (!%p3171_p3), 1, %s2610_s16   ;;  %p3172_p7 = scmp.ne.s32.totalorder (!%p3171_p3), %s3163_s25, 0 }
  0x50   : > { %249 = sbr.rel (%p3171_p3) target bundleno = 516 (0x204), region = 36  ;;  %s1846_s11 = sshll.u32 (!%p3171_p3), %s2814_s7, 9 }
  0x51   : > { %s252_s12 = scalar_lea.sflag (!%p3171_p3), [#allocation3], %s2814_s7  ;;  %s2818_s29 = scalar_lea.vmem (!%p3171_p3), [#allocation2], %s1846_s11 }
  0x57   : > { %2593 = dma.done.wait (%p3172_p7), %s252_s12, 8192  }
  0x58   : > { %2595 = vsyncadd (%p3172_p7), %s252_s12, 4294959104  ;;  %p3173_p13 = scmp.ne.s32.totalorder %s3161_s23, 0 }
  0x5a   : > { %2597 = dma.done.wait (%p3173_p13), [#allocation6], 2048  }
  0x5b   : > { %2599 = vsyncadd (%p3173_p13), [#allocation6], 4294965248  ;;  %v2634_v0 = vmov 0   ;;  %v2370_v1 = vld [vmem:[#allocation5] sm:$0xff]   ;;  %v2371_v2 = vld [vmem:[#allocation5 + $0x8] sm:$0xff]   ;;  %s1848_s21 = sshll.u32 %s2814_s7, 8 }
  0x5c   : > { %813 = vmatprep.subr.bf16.mxu0 %v2634_v0  ;;  %2258 = vmatprep.subr.bf16.mxu1 %v2634_v0  ;;  %v2372_v3 = vld [vmem:[#allocation5 + $0x10] sm:$0xff]   ;;  %v2373_v4 = vld [vmem:[#allocation5 + $0x18] sm:$0xff]   ;;  %v2374_v5 = vld [vmem:[#allocation5 + $0x20] sm:$0xff]   ;;  %s2949_s22 = scalar_lea.vmem [#allocation7], %s1848_s21  ;;  %s2066_s28 = sshll.u32 %s2618_s18, 12 }
  0x5d   : > { %814 = vmatpush1.bf16.msra.mxu0 %v2370_v1  ;;  %2274 = vmatpush1.bf16.msra.mxu1 %v2370_v1  ;;  %v2388_v6 = vld [vmem:[%s2818_s29 + $0x4] ss:$8 sps:$4 sm:$0xff]   ;;  %v2376_v9 = vld [vmem:[#allocation5 + $0x30] sm:$0xff]   ;;  %v2377_v10 = vld [vmem:[#allocation5 + $0x38] sm:$0xff]   ;;  %s1707_s13 = sshll.u32 %s2949_s22, 4  ;;  %s3100_s6 = scalar_lea.hbm %s3156_s4, %s2066_s28  ;;  %s3102_s13 = int_to_ptr.vmem [resolvable:$true] %s1707_s13 }
  0x5e   : > { %815 = vmatprep.subr.bf16.mxu0 %v2634_v0  ;;  %2259 = vmatprep.subr.bf16.mxu1 %v2634_v0  ;;  %v2375_v7 = vld [vmem:[#allocation5 + $0x28] sm:$0xff]   ;;  %v2378_v11 = vld [vmem:[#allocation5 + $0x40] sm:$0xff]   ;;  %v2380_v13 = vld [vmem:[#allocation5 + $0x50] sm:$0xff]   ;;  %s1693_s18 = scalar_lea.sflag [#allocation4], %s2814_s7  ;;  %s2540_s9 = scalar_lea.vmem %s3102_s13, 4096 }
  0x5f   : > { %v2391_v8 = vld [vmem:[%s2818_s29 + $0x104] ss:$8 sps:$4 sm:$0xff]   ;;  %845 = vmatprep.mubr.bf16.mxu0 %v2388_v6  ;;  %v2381_v14 = vld [vmem:[#allocation5 + $0x58] sm:$0xff]   ;;  %v2384_v17 = vld [vmem:[#allocation5 + $0x70] sm:$0xff]   ;;  %p2541_p4 = scmp.ne.s32.totalorder %s3102_s13, %s2540_s9  ;;  %s2635_s11 = smov [#allocation7]  }
  0x60   : > { %973 = vmatprep.mubr.bf16.mxu1 %v2391_v8  ;;  %v2379_v12 = vld [vmem:[#allocation5 + $0x48] sm:$0xff]   ;;  %v2382_v15 = vld [vmem:[#allocation5 + $0x60] sm:$0xff]   ;;  %v2385_v18 = vld [vmem:[#allocation5 + $0x78] sm:$0xff]   ;;  %s2544_s12 = sshll.u32 %s2635_s11, 4  ;;  %s2545_s12 = int_to_ptr.vmem [resolvable:$false] %s2544_s12 }
  0x61   : > { %816 = vmatpush1.bf16.msra.mxu0 %v2371_v2  ;;  %2275 = vmatpush1.bf16.msra.mxu1 %v2371_v2  ;;  %v2383_v16 = vld [vmem:[#allocation5 + $0x68] sm:$0xff]   ;;  %v2392_v21 = vld [vmem:[%s2818_s29 + $0x14] ss:$8 sps:$4 sm:$0xff]   ;;  %v2396_v23 = vld [vmem:[%s2818_s29 + $0x10] ss:$8 sps:$4 sm:$0xff]   ;;  %p2542_p6 = pnand %p2541_p4, %p2758_p11  ;;  %p2547_p12 = scmp.lt.s32.totalorder %s3102_s13, %s2545_s12 }
  0x62   : > { %817 = vmatprep.subr.bf16.mxu0 %v2634_v0  ;;  %2260 = vmatprep.subr.bf16.mxu1 %v2634_v0  ;;  %v2386_v19 = vld [vmem:[%s2818_s29] ss:$8 sps:$4 sm:$0xff]   ;;  %v2394_v22 = vld [vmem:[%s2818_s29 + $0x114] ss:$8 sps:$4 sm:$0xff]   ;;  %v2397_v24 = vld [vmem:[%s2818_s29 + $0x110] ss:$8 sps:$4 sm:$0xff]  }
  0x63   : > { %v2389_v20 = vld [vmem:[%s2818_s29 + $0x100] ss:$8 sps:$4 sm:$0xff]   ;;  %v2398_v25 = vld [vmem:[%s2818_s29 + $0x24] ss:$8 sps:$4 sm:$0xff]   ;;  %v2404_v29 = vld [vmem:[%s2818_s29 + $0x34] ss:$8 sps:$4 sm:$0xff]   ;;  %p2543_p8 = pneg %p2542_p6 }
  0x64   : > { %v2400_v26 = vld [vmem:[%s2818_s29 + $0x124] ss:$8 sps:$4 sm:$0xff]   ;;  %v2402_v27 = vld [vmem:[%s2818_s29 + $0x20] ss:$8 sps:$4 sm:$0xff]   ;;  %v2406_v30 = vld [vmem:[%s2818_s29 + $0x134] ss:$8 sps:$4 sm:$0xff]  }
  0x65   : > { %818 = vmatpush1.bf16.msra.mxu0 %v2372_v3  ;;  %2276 = vmatpush1.bf16.msra.mxu1 %v2372_v3  ;;  %v2403_v28 = vld [vmem:[%s2818_s29 + $0x120] ss:$8 sps:$4 sm:$0xff]   ;;  %v2408_v31 = vld [vmem:[%s2818_s29 + $0x30] ss:$8 sps:$4 sm:$0xff]   ;;  %v2410_v33 = vld [vmem:[%s2818_s29 + $0x44] ss:$8 sps:$4 sm:$0xff]  }
  0x66   : > { %819 = vmatprep.subr.bf16.mxu0 %v2634_v0  ;;  %2261 = vmatprep.subr.bf16.mxu1 %v2634_v0  ;;  %v2409_v32 = vld [vmem:[%s2818_s29 + $0x130] ss:$8 sps:$4 sm:$0xff]   ;;  %v2412_v34 = vld [vmem:[%s2818_s29 + $0x144] ss:$8 sps:$4 sm:$0xff]   ;;  %v2414_v35 = vld [vmem:[%s2818_s29 + $0x40] ss:$8 sps:$4 sm:$0xff]  }
  0x67   : > { %v2415_v36 = vld [vmem:[%s2818_s29 + $0x140] ss:$8 sps:$4 sm:$0xff]   ;;  %v2416_v37 = vld [vmem:[%s2818_s29 + $0x54] ss:$8 sps:$4 sm:$0xff]   ;;  %v2420_v39 = vld [vmem:[%s2818_s29 + $0x50] ss:$8 sps:$4 sm:$0xff]  }
  0x68   : > { %v2418_v38 = vld [vmem:[%s2818_s29 + $0x154] ss:$8 sps:$4 sm:$0xff]   ;;  %v2421_v40 = vld [vmem:[%s2818_s29 + $0x150] ss:$8 sps:$4 sm:$0xff]   ;;  %v2422_v41 = vld [vmem:[%s2818_s29 + $0x64] ss:$8 sps:$4 sm:$0xff]  }
  0x69   : > { %820 = vmatpush1.bf16.msra.mxu0 %v2373_v4  ;;  %2277 = vmatpush1.bf16.msra.mxu1 %v2373_v4  ;;  %v2424_v42 = vld [vmem:[%s2818_s29 + $0x164] ss:$8 sps:$4 sm:$0xff]   ;;  %v2426_v43 = vld [vmem:[%s2818_s29 + $0x60] ss:$8 sps:$4 sm:$0xff]   ;;  %v2428_v45 = vld [vmem:[%s2818_s29 + $0x74] ss:$8 sps:$4 sm:$0xff]  }
  0x6a   : > { %821 = vmatprep.subr.bf16.mxu0 %v2634_v0  ;;  %2262 = vmatprep.subr.bf16.mxu1 %v2634_v0  ;;  %v2427_v44 = vld [vmem:[%s2818_s29 + $0x160] ss:$8 sps:$4 sm:$0xff]   ;;  %v2430_v46 = vld [vmem:[%s2818_s29 + $0x174] ss:$8 sps:$4 sm:$0xff]   ;;  %v2432_v47 = vld [vmem:[%s2818_s29 + $0x70] ss:$8 sps:$4 sm:$0xff]  }
  0x6b   : > { %v2433_v48 = vld [vmem:[%s2818_s29 + $0x170] ss:$8 sps:$4 sm:$0xff]   ;;  %v2434_v49 = vld [vmem:[%s2818_s29 + $0x84] ss:$8 sps:$4 sm:$0xff]   ;;  %v2438_v51 = vld [vmem:[%s2818_s29 + $0x80] ss:$8 sps:$4 sm:$0xff]  }
  0x6c   : > { %v2436_v50 = vld [vmem:[%s2818_s29 + $0x184] ss:$8 sps:$4 sm:$0xff]   ;;  %v2439_v52 = vld [vmem:[%s2818_s29 + $0x180] ss:$8 sps:$4 sm:$0xff]   ;;  %v2440_v53 = vld [vmem:[%s2818_s29 + $0x94] ss:$8 sps:$4 sm:$0xff]  }
  0x6d   : > { %822 = vmatpush1.bf16.msra.mxu0 %v2374_v5  ;;  %2278 = vmatpush1.bf16.msra.mxu1 %v2374_v5  ;;  %v2442_v54 = vld [vmem:[%s2818_s29 + $0x194] ss:$8 sps:$4 sm:$0xff]   ;;  %v2444_v55 = vld [vmem:[%s2818_s29 + $0x90] ss:$8 sps:$4 sm:$0xff]   ;;  %v2446_v57 = vld [vmem:[%s2818_s29 + $0xa4] ss:$8 sps:$4 sm:$0xff]  }
  0x6e   : > { %823 = vmatprep.subr.bf16.mxu0 %v2634_v0  ;;  %2263 = vmatprep.subr.bf16.mxu1 %v2634_v0  ;;  %v2445_v56 = vld [vmem:[%s2818_s29 + $0x190] ss:$8 sps:$4 sm:$0xff]   ;;  %v2448_v58 = vld [vmem:[%s2818_s29 + $0x1a4] ss:$8 sps:$4 sm:$0xff]   ;;  %v2450_v59 = vld [vmem:[%s2818_s29 + $0xa0] ss:$8 sps:$4 sm:$0xff]  }
  0x6f   : > { %v2451_v60 = vld [vmem:[%s2818_s29 + $0x1a0] ss:$8 sps:$4 sm:$0xff]   ;;  %v2452_v61 = vld [vmem:[%s2818_s29 + $0xb4] ss:$8 sps:$4 sm:$0xff]   ;;  %v2456_v63 = vld [vmem:[%s2818_s29 + $0xb0] ss:$8 sps:$4 sm:$0xff]  }
  0x70   : > { %v2454_v62 = vld [vmem:[%s2818_s29 + $0x1b4] ss:$8 sps:$4 sm:$0xff]   ;;  %v2458_v1 = vld [vmem:[%s2818_s29 + $0xc4] ss:$8 sps:$4 sm:$0xff]   ;;  %v2462_v3 = vld [vmem:[%s2818_s29 + $0xc0] ss:$8 sps:$4 sm:$0xff]  }
  0x71   : > { %824 = vmatpush1.bf16.msra.mxu0 %v2375_v7  ;;  %2279 = vmatpush1.bf16.msra.mxu1 %v2375_v7  ;;  %v2460_v2 = vld [vmem:[%s2818_s29 + $0x1c4] ss:$8 sps:$4 sm:$0xff]   ;;  %v2463_v4 = vld [vmem:[%s2818_s29 + $0x1c0] ss:$8 sps:$4 sm:$0xff]   ;;  %v2464_v5 = vld [vmem:[%s2818_s29 + $0xd4] ss:$8 sps:$4 sm:$0xff]  }
  0x72   : > { %825 = vmatprep.subr.bf16.mxu0 %v2634_v0  ;;  %2264 = vmatprep.subr.bf16.mxu1 %v2634_v0  ;;  %v2466_v6 = vld [vmem:[%s2818_s29 + $0x1d4] ss:$8 sps:$4 sm:$0xff]   ;;  %v2468_v7 = vld [vmem:[%s2818_s29 + $0xd0] ss:$8 sps:$4 sm:$0xff]  }
  0x73   : > { %v2469_v8 = vld [vmem:[%s2818_s29 + $0x1d0] ss:$8 sps:$4 sm:$0xff]  }
  0x75   : > { %826 = vmatpush1.bf16.msra.mxu0 %v2376_v9  ;;  %2280 = vmatpush1.bf16.msra.mxu1 %v2376_v9  ;;  %v2470_v9 = vld [vmem:[%s2818_s29 + $0xe4] ss:$8 sps:$4 sm:$0xff]  }
  0x76   : > { %827 = vmatprep.subr.bf16.mxu0 %v2634_v0  ;;  %2265 = vmatprep.subr.bf16.mxu1 %v2634_v0 }
  0x79   : > { %828 = vmatpush1.bf16.msra.mxu0 %v2377_v10  ;;  %2281 = vmatpush1.bf16.msra.mxu1 %v2377_v10  ;;  %v2472_v10 = vld [vmem:[%s2818_s29 + $0x1e4] ss:$8 sps:$4 sm:$0xff]  }
  0x7a   : > { %829 = vmatprep.subr.bf16.mxu0 %v2634_v0  ;;  %2266 = vmatprep.subr.bf16.mxu1 %v2634_v0 }
  0x7d   : > { %830 = vmatpush1.bf16.msra.mxu0 %v2378_v11  ;;  %2282 = vmatpush1.bf16.msra.mxu1 %v2378_v11  ;;  %v2474_v11 = vld [vmem:[%s2818_s29 + $0xe0] ss:$8 sps:$4 sm:$0xff]  }
  0x7e   : > { %831 = vmatprep.subr.bf16.mxu0 %v2634_v0  ;;  %2267 = vmatprep.subr.bf16.mxu1 %v2634_v0 }
  0x81   : > { %832 = vmatpush1.bf16.msra.mxu0 %v2379_v12  ;;  %2283 = vmatpush1.bf16.msra.mxu1 %v2379_v12  ;;  %v2475_v12 = vld [vmem:[%s2818_s29 + $0x1e0] ss:$8 sps:$4 sm:$0xff]  }
  0x82   : > { %833 = vmatprep.subr.bf16.mxu0 %v2634_v0  ;;  %2268 = vmatprep.subr.bf16.mxu1 %v2634_v0 }
  0x85   : > { %834 = vmatpush1.bf16.msra.mxu0 %v2380_v13  ;;  %2284 = vmatpush1.bf16.msra.mxu1 %v2380_v13  ;;  %v2476_v13 = vld [vmem:[%s2818_s29 + $0xf4] ss:$8 sps:$4 sm:$0xff]  }
  0x86   : > { %835 = vmatprep.subr.bf16.mxu0 %v2634_v0  ;;  %2269 = vmatprep.subr.bf16.mxu1 %v2634_v0 }
  0x89   : > { %836 = vmatpush1.bf16.msra.mxu0 %v2381_v14  ;;  %2285 = vmatpush1.bf16.msra.mxu1 %v2381_v14  ;;  %v2478_v14 = vld [vmem:[%s2818_s29 + $0x1f4] ss:$8 sps:$4 sm:$0xff]  }
  0x8a   : > { %837 = vmatprep.subr.bf16.mxu0 %v2634_v0  ;;  %2270 = vmatprep.subr.bf16.mxu1 %v2634_v0 }
  0x8d   : > { %838 = vmatpush1.bf16.msra.mxu0 %v2382_v15  ;;  %2286 = vmatpush1.bf16.msra.mxu1 %v2382_v15  ;;  %v2480_v15 = vld [vmem:[%s2818_s29 + $0xf0] ss:$8 sps:$4 sm:$0xff]  }
  0x8e   : > { %839 = vmatprep.subr.bf16.mxu0 %v2634_v0  ;;  %2271 = vmatprep.subr.bf16.mxu1 %v2634_v0 }
  0x91   : > { %840 = vmatpush1.bf16.msra.mxu0 %v2383_v16  ;;  %2287 = vmatpush1.bf16.msra.mxu1 %v2383_v16  ;;  %v2481_v16 = vld [vmem:[%s2818_s29 + $0x1f0] ss:$8 sps:$4 sm:$0xff]  }
  0x92   : > { %841 = vmatprep.subr.bf16.mxu0 %v2634_v0  ;;  %2272 = vmatprep.subr.bf16.mxu1 %v2634_v0 }
  0x95   : > { %842 = vmatpush1.bf16.msra.mxu0 %v2384_v17  ;;  %2288 = vmatpush1.bf16.msra.mxu1 %v2384_v17  ;;  %v2927_v17 = vld [vmem:[%s3154_s2] ss:$0 sm:$0xff] }
  0x96   : > { %843 = vmatprep.subr.bf16.mxu0 %v2634_v0  ;;  %2273 = vmatprep.subr.bf16.mxu1 %v2634_v0  ;;  %v2457_v0 = vld [vmem:[%s2818_s29 + $0x1b0] ss:$8 sps:$4 sm:$0xff]   ;;  %s2546_s29 = scalar_lea.vmem %s2545_s12, 8192 }
  0x97   : > { %p2548_p10 = scmp.lt.s32.totalorder %s2546_s29, %s2540_s9 }
  0x99   : > { %844 = vmatpush1.bf16.msra.mxu0 %v2385_v18  ;;  %2289 = vmatpush1.bf16.msra.mxu1 %v2385_v18  ;;  %p2549_p0 = por %p2548_p10, %p2547_p12 }
  0x9b   : > { %p2550_p5 = pnand %p2549_p0, %p2543_p8 }
  0x9c   : > { %846 = vmatmul.mubr.bf16.vlgmr.msra.gmra.mrb[0].mxu0 %v2386_v19  ;;  %974 = vmatmul.mubr.bf16.vlgmr.msra.gmra.mrb[0].mxu1 %v2389_v20  ;;  %v2932_v19 = vld [vmem:[%s3155_s3] ss:$0 sm:$0xff] }
  0x9d   : > { %853 = vmatprep.mubr.bf16.mxu0 %v2392_v21  ;;  %981 = vmatprep.mubr.bf16.mxu1 %v2394_v22 }
  0xa4   : > { %854 = vmatmul.mubr.bf16.gmra.mrb[4].mxu0 %v2396_v23  ;;  %982 = vmatmul.mubr.bf16.gmra.mrb[4].mxu1 %v2397_v24 }
  0xa5   : > { %861 = vmatprep.mubr.bf16.mxu0 %v2398_v25  ;;  %989 = vmatprep.mubr.bf16.mxu1 %v2400_v26 }
  0xac   : > { %862 = vmatmul.mubr.bf16.gmra.mrb[8].mxu0 %v2402_v27  ;;  %990 = vmatmul.mubr.bf16.gmra.mrb[8].mxu1 %v2403_v28 }
  0xad   : > { %869 = vmatprep.mubr.bf16.mxu0 %v2404_v29  ;;  %997 = vmatprep.mubr.bf16.mxu1 %v2406_v30 }
  0xb4   : > { %870 = vmatmul.mubr.bf16.gmra.mrb[12].mxu0 %v2408_v31  ;;  %998 = vmatmul.mubr.bf16.gmra.mrb[12].mxu1 %v2409_v32 }
  0xb5   : > { %877 = vmatprep.mubr.bf16.mxu0 %v2410_v33  ;;  %1005 = vmatprep.mubr.bf16.mxu1 %v2412_v34 }
  0xbc   : > { %878 = vmatmul.mubr.bf16.gmra.mrb[16].mxu0 %v2414_v35  ;;  %1006 = vmatmul.mubr.bf16.gmra.mrb[16].mxu1 %v2415_v36 }
  0xbd   : > { %885 = vmatprep.mubr.bf16.mxu0 %v2416_v37  ;;  %1013 = vmatprep.mubr.bf16.mxu1 %v2418_v38 }
  0xc4   : > { %886 = vmatmul.mubr.bf16.gmra.mrb[20].mxu0 %v2420_v39  ;;  %1014 = vmatmul.mubr.bf16.gmra.mrb[20].mxu1 %v2421_v40 }
  0xc5   : > { %893 = vmatprep.mubr.bf16.mxu0 %v2422_v41  ;;  %1021 = vmatprep.mubr.bf16.mxu1 %v2424_v42 }
  0xcc   : > { %894 = vmatmul.mubr.bf16.gmra.mrb[24].mxu0 %v2426_v43  ;;  %1022 = vmatmul.mubr.bf16.gmra.mrb[24].mxu1 %v2427_v44 }
  0xcd   : > { %901 = vmatprep.mubr.bf16.mxu0 %v2428_v45  ;;  %1029 = vmatprep.mubr.bf16.mxu1 %v2430_v46 }
  0xd4   : > { %902 = vmatmul.mubr.bf16.gmra.mrb[28].mxu0 %v2432_v47  ;;  %1030 = vmatmul.mubr.bf16.gmra.mrb[28].mxu1 %v2433_v48 }
  0xd5   : > { %909 = vmatprep.mubr.bf16.mxu0 %v2434_v49  ;;  %1037 = vmatprep.mubr.bf16.mxu1 %v2436_v50 }
  0xdc   : > { %910 = vmatmul.mubr.bf16.gmra.mrb[32].mxu0 %v2438_v51  ;;  %1038 = vmatmul.mubr.bf16.gmra.mrb[32].mxu1 %v2439_v52 }
  0xdd   : > { %917 = vmatprep.mubr.bf16.mxu0 %v2440_v53  ;;  %1045 = vmatprep.mubr.bf16.mxu1 %v2442_v54 }
  0xe4   : > { %918 = vmatmul.mubr.bf16.gmra.mrb[36].mxu0 %v2444_v55  ;;  %1046 = vmatmul.mubr.bf16.gmra.mrb[36].mxu1 %v2445_v56 }
  0xe5   : > { %925 = vmatprep.mubr.bf16.mxu0 %v2446_v57  ;;  %1053 = vmatprep.mubr.bf16.mxu1 %v2448_v58 }
  0xec   : > { %926 = vmatmul.mubr.bf16.gmra.mrb[40].mxu0 %v2450_v59  ;;  %1054 = vmatmul.mubr.bf16.gmra.mrb[40].mxu1 %v2451_v60 }
  0xed   : > { %933 = vmatprep.mubr.bf16.mxu0 %v2452_v61  ;;  %1061 = vmatprep.mubr.bf16.mxu1 %v2454_v62 }
  0xf4   : > { %934 = vmatmul.mubr.bf16.gmra.mrb[44].mxu0 %v2456_v63  ;;  %1062 = vmatmul.mubr.bf16.gmra.mrb[44].mxu1 %v2457_v0 }
  0xf5   : > { %941 = vmatprep.mubr.bf16.mxu0 %v2458_v1  ;;  %1069 = vmatprep.mubr.bf16.mxu1 %v2460_v2 }
  0xfc   : > { %942 = vmatmul.mubr.bf16.gmra.mrb[48].mxu0 %v2462_v3  ;;  %1070 = vmatmul.mubr.bf16.gmra.mrb[48].mxu1 %v2463_v4 }
  0xfd   : > { %949 = vmatprep.mubr.bf16.mxu0 %v2464_v5  ;;  %1077 = vmatprep.mubr.bf16.mxu1 %v2466_v6 }
 0x104   : > { %950 = vmatmul.mubr.bf16.gmra.mrb[52].mxu0 %v2468_v7  ;;  %1078 = vmatmul.mubr.bf16.gmra.mrb[52].mxu1 %v2469_v8 }
 0x105   : > { %957 = vmatprep.mubr.bf16.mxu0 %v2470_v9  ;;  %1085 = vmatprep.mubr.bf16.mxu1 %v2472_v10 }
 0x10c   : > { %958 = vmatmul.mubr.bf16.gmra.mrb[56].mxu0 %v2474_v11  ;;  %1086 = vmatmul.mubr.bf16.gmra.mrb[56].mxu1 %v2475_v12 }
 0x10d   : > { %965 = vmatprep.mubr.bf16.mxu0 %v2476_v13  ;;  %1093 = vmatprep.mubr.bf16.mxu1 %v2478_v14 }
 0x114   : > { %966 = vmatmul.mubr.bf16.gmra.mrb[60].mxu0 %v2480_v15  ;;  %1094 = vmatmul.mubr.bf16.gmra.mrb[60].mxu1 %v2481_v16 }
 0x16f   : > { %v847_v18 = vpop.f32.mrb[0].mxu0  ;;  %v975_v20 = vpop.f32.mrb[0].mxu1 }
 0x170   : > { %v1109_v21 = vmul.f32 %v2927_v17, %v847_v18  ;;  %v1141_v22 = vmul.f32 %v2927_v17, %v975_v20  ;;  %v849_v23 = vpop.f32.mrb[1].mxu0  ;;  %v977_v24 = vpop.f32.mrb[1].mxu1 }
 0x171   : > { %v850_v25 = vpop.f32.mrb[2].mxu0  ;;  %v978_v26 = vpop.f32.mrb[2].mxu1 }
 0x172   : > { %v1180_v27 = vadd.f32 %v2932_v19, %v1109_v21  ;;  %v1212_v28 = vadd.f32 %v2932_v19, %v1141_v22  ;;  %v1110_v29 = vmul.f32 %v2927_v17, %v850_v25  ;;  %v1142_v30 = vmul.f32 %v2927_v17, %v978_v26  ;;  %v852_v31 = vpop.f32.mrb[3].mxu0  ;;  %v980_v32 = vpop.f32.mrb[3].mxu1 }
 0x174   : > { %v1244_v33 = vmul.f32 0.1, %v1180_v27  ;;  %v1276_v34 = vmul.f32 0.1, %v1212_v28  ;;  %v1181_v35 = vadd.f32 %v2932_v19, %v1110_v29  ;;  %v1213_v36 = vadd.f32 %v2932_v19, %v1142_v30 }
 0x176   : > { %v1245_v37 = vmul.f32 0.1, %v1181_v35  ;;  %v1277_v38 = vmul.f32 0.1, %v1213_v36  ;;  %v1308_v39 = vmax.f32 %v1180_v27, %v1244_v33  ;;  %v1340_v40 = vmax.f32 %v1212_v28, %v1276_v34 }
 0x177   : > { %v855_v41 = vpop.f32.mrb[4].mxu0  ;;  %v983_v42 = vpop.f32.mrb[4].mxu1 }
 0x178   : > { %v1309_v43 = vmax.f32 %v1181_v35, %v1245_v37  ;;  %v1341_v44 = vmax.f32 %v1213_v36, %v1277_v38  ;;  %v1111_v45 = vmul.f32 %v2927_v17, %v855_v41  ;;  %v1143_v46 = vmul.f32 %v2927_v17, %v983_v42  ;;  %v857_v47 = vpop.f32.mrb[5].mxu0  ;;  %v985_v48 = vpop.f32.mrb[5].mxu1 }
 0x179   : > { %v858_v49 = vpop.f32.mrb[6].mxu0  ;;  %v986_v50 = vpop.f32.mrb[6].mxu1 }
 0x17a   : > { %v2070_v51 = vpack.c.bf16 %v1309_v43, %v1308_v39  ;;  %v2150_v52 = vpack.c.bf16 %v1341_v44, %v1340_v40  ;;  %v1182_v53 = vadd.f32 %v2932_v19, %v1111_v45  ;;  %v1214_v54 = vadd.f32 %v2932_v19, %v1143_v46  ;;  %v860_v55 = vpop.f32.mrb[7].mxu0  ;;  %v988_v56 = vpop.f32.mrb[7].mxu1 }
 0x17b   : > { %v1112_v57 = vmul.f32 %v2927_v17, %v858_v49  ;;  %v1144_v58 = vmul.f32 %v2927_v17, %v986_v50 }
 0x17c   : > { %2071 = vst [vmem:[%s2949_s22] sm:$0xff] %v2070_v51   ;;  %2242 = vst [vmem:[%s2949_s22 + $0x80] sm:$0xff] %v2150_v52   ;;  %v1246_v59 = vmul.f32 0.1, %v1182_v53  ;;  %v1278_v60 = vmul.f32 0.1, %v1214_v54 }
 0x17d   : > { %v1183_v61 = vadd.f32 %v2932_v19, %v1112_v57  ;;  %v1215_v62 = vadd.f32 %v2932_v19, %v1144_v58 }
 0x17e   : > { %v1310_v7 = vmax.f32 %v1182_v53, %v1246_v59  ;;  %v1342_v8 = vmax.f32 %v1214_v54, %v1278_v60 }
 0x17f   : > { %v1247_v63 = vmul.f32 0.1, %v1183_v61  ;;  %v1279_v0 = vmul.f32 0.1, %v1215_v62  ;;  %v863_v1 = vpop.f32.mrb[8].mxu0  ;;  %v991_v2 = vpop.f32.mrb[8].mxu1 }
 0x180   : > { %v1113_v3 = vmul.f32 %v2927_v17, %v863_v1  ;;  %v1145_v4 = vmul.f32 %v2927_v17, %v991_v2  ;;  %v865_v5 = vpop.f32.mrb[9].mxu0  ;;  %v993_v6 = vpop.f32.mrb[9].mxu1 }
 0x181   : > { %v1311_v9 = vmax.f32 %v1183_v61, %v1247_v63  ;;  %v1343_v10 = vmax.f32 %v1215_v62, %v1279_v0  ;;  %v866_v11 = vpop.f32.mrb[10].mxu0  ;;  %v994_v12 = vpop.f32.mrb[10].mxu1 }
 0x182   : > { %v1184_v13 = vadd.f32 %v2932_v19, %v1113_v3  ;;  %v1216_v14 = vadd.f32 %v2932_v19, %v1145_v4  ;;  %v1114_v15 = vmul.f32 %v2927_v17, %v866_v11  ;;  %v1146_v16 = vmul.f32 %v2927_v17, %v994_v12  ;;  %v868_v18 = vpop.f32.mrb[11].mxu0  ;;  %v996_v20 = vpop.f32.mrb[11].mxu1 }
 0x183   : > { %v2075_v21 = vpack.c.bf16 %v1311_v9, %v1310_v7  ;;  %v2155_v22 = vpack.c.bf16 %v1343_v10, %v1342_v8 }
 0x184   : > { %v1248_v23 = vmul.f32 0.1, %v1184_v13  ;;  %v1280_v24 = vmul.f32 0.1, %v1216_v14  ;;  %v1185_v25 = vadd.f32 %v2932_v19, %v1114_v15  ;;  %v1217_v26 = vadd.f32 %v2932_v19, %v1146_v16 }
 0x185   : > { %2227 = vst [vmem:[%s2949_s22 + $0x8] sm:$0xff] %v2075_v21   ;;  %2243 = vst [vmem:[%s2949_s22 + $0x88] sm:$0xff] %v2155_v22  }
 0x186   : > { %v1249_v27 = vmul.f32 0.1, %v1185_v25  ;;  %v1281_v28 = vmul.f32 0.1, %v1217_v26  ;;  %v1312_v29 = vmax.f32 %v1184_v13, %v1248_v23  ;;  %v1344_v30 = vmax.f32 %v1216_v14, %v1280_v24 }
 0x187   : > { %v871_v31 = vpop.f32.mrb[12].mxu0  ;;  %v999_v32 = vpop.f32.mrb[12].mxu1 }
 0x188   : > { %v1313_v33 = vmax.f32 %v1185_v25, %v1249_v27  ;;  %v1345_v34 = vmax.f32 %v1217_v26, %v1281_v28  ;;  %v1115_v35 = vmul.f32 %v2927_v17, %v871_v31  ;;  %v1147_v36 = vmul.f32 %v2927_v17, %v999_v32  ;;  %v873_v37 = vpop.f32.mrb[13].mxu0  ;;  %v1001_v38 = vpop.f32.mrb[13].mxu1 }
 0x189   : > { %v874_v39 = vpop.f32.mrb[14].mxu0  ;;  %v1002_v40 = vpop.f32.mrb[14].mxu1 }
 0x18a   : > { %v2080_v41 = vpack.c.bf16 %v1313_v33, %v1312_v29  ;;  %v2160_v42 = vpack.c.bf16 %v1345_v34, %v1344_v30  ;;  %v1186_v43 = vadd.f32 %v2932_v19, %v1115_v35  ;;  %v1218_v44 = vadd.f32 %v2932_v19, %v1147_v36  ;;  %v876_v45 = vpop.f32.mrb[15].mxu0  ;;  %v1004_v46 = vpop.f32.mrb[15].mxu1 }
 0x18b   : > { %v1116_v47 = vmul.f32 %v2927_v17, %v874_v39  ;;  %v1148_v48 = vmul.f32 %v2927_v17, %v1002_v40 }
 0x18c   : > { %2228 = vst [vmem:[%s2949_s22 + $0x10] sm:$0xff] %v2080_v41   ;;  %2244 = vst [vmem:[%s2949_s22 + $0x90] sm:$0xff] %v2160_v42   ;;  %v1250_v49 = vmul.f32 0.1, %v1186_v43  ;;  %v1282_v50 = vmul.f32 0.1, %v1218_v44 }
 0x18d   : > { %v1187_v51 = vadd.f32 %v2932_v19, %v1116_v47  ;;  %v1219_v52 = vadd.f32 %v2932_v19, %v1148_v48 }
 0x18e   : > { %v1314_v61 = vmax.f32 %v1186_v43, %v1250_v49  ;;  %v1346_v62 = vmax.f32 %v1218_v44, %v1282_v50 }
 0x18f   : > { %v1251_v53 = vmul.f32 0.1, %v1187_v51  ;;  %v1283_v54 = vmul.f32 0.1, %v1219_v52  ;;  %v879_v55 = vpop.f32.mrb[16].mxu0  ;;  %v1007_v56 = vpop.f32.mrb[16].mxu1 }
 0x190   : > { %v1117_v57 = vmul.f32 %v2927_v17, %v879_v55  ;;  %v1149_v58 = vmul.f32 %v2927_v17, %v1007_v56  ;;  %v881_v59 = vpop.f32.mrb[17].mxu0  ;;  %v1009_v60 = vpop.f32.mrb[17].mxu1 }
 0x191   : > { %v1315_v63 = vmax.f32 %v1187_v51, %v1251_v53  ;;  %v1347_v0 = vmax.f32 %v1219_v52, %v1283_v54  ;;  %v882_v1 = vpop.f32.mrb[18].mxu0  ;;  %v1010_v2 = vpop.f32.mrb[18].mxu1 }
 0x192   : > { %v1188_v3 = vadd.f32 %v2932_v19, %v1117_v57  ;;  %v1220_v4 = vadd.f32 %v2932_v19, %v1149_v58  ;;  %v1118_v5 = vmul.f32 %v2927_v17, %v882_v1  ;;  %v1150_v6 = vmul.f32 %v2927_v17, %v1010_v2  ;;  %v884_v7 = vpop.f32.mrb[19].mxu0  ;;  %v1012_v8 = vpop.f32.mrb[19].mxu1 }
 0x193   : > { %v2085_v9 = vpack.c.bf16 %v1315_v63, %v1314_v61  ;;  %v2165_v10 = vpack.c.bf16 %v1347_v0, %v1346_v62 }
 0x194   : > { %v1252_v11 = vmul.f32 0.1, %v1188_v3  ;;  %v1284_v12 = vmul.f32 0.1, %v1220_v4  ;;  %v1189_v13 = vadd.f32 %v2932_v19, %v1118_v5  ;;  %v1221_v14 = vadd.f32 %v2932_v19, %v1150_v6 }
 0x195   : > { %2229 = vst [vmem:[%s2949_s22 + $0x18] sm:$0xff] %v2085_v9   ;;  %2245 = vst [vmem:[%s2949_s22 + $0x98] sm:$0xff] %v2165_v10  }
 0x196   : > { %v1253_v15 = vmul.f32 0.1, %v1189_v13  ;;  %v1285_v16 = vmul.f32 0.1, %v1221_v14  ;;  %v1316_v18 = vmax.f32 %v1188_v3, %v1252_v11  ;;  %v1348_v20 = vmax.f32 %v1220_v4, %v1284_v12 }
 0x197   : > { %v887_v21 = vpop.f32.mrb[20].mxu0  ;;  %v1015_v22 = vpop.f32.mrb[20].mxu1 }
 0x198   : > { %v1317_v23 = vmax.f32 %v1189_v13, %v1253_v15  ;;  %v1349_v24 = vmax.f32 %v1221_v14, %v1285_v16  ;;  %v1119_v25 = vmul.f32 %v2927_v17, %v887_v21  ;;  %v1151_v26 = vmul.f32 %v2927_v17, %v1015_v22  ;;  %v889_v27 = vpop.f32.mrb[21].mxu0  ;;  %v1017_v28 = vpop.f32.mrb[21].mxu1 }
 0x199   : > { %v890_v29 = vpop.f32.mrb[22].mxu0  ;;  %v1018_v30 = vpop.f32.mrb[22].mxu1 }
 0x19a   : > { %v2090_v31 = vpack.c.bf16 %v1317_v23, %v1316_v18  ;;  %v2170_v32 = vpack.c.bf16 %v1349_v24, %v1348_v20  ;;  %v1190_v33 = vadd.f32 %v2932_v19, %v1119_v25  ;;  %v1222_v34 = vadd.f32 %v2932_v19, %v1151_v26  ;;  %v892_v35 = vpop.f32.mrb[23].mxu0  ;;  %v1020_v36 = vpop.f32.mrb[23].mxu1 }
 0x19b   : > { %v1120_v37 = vmul.f32 %v2927_v17, %v890_v29  ;;  %v1152_v38 = vmul.f32 %v2927_v17, %v1018_v30 }
 0x19c   : > { %2230 = vst [vmem:[%s2949_s22 + $0x20] sm:$0xff] %v2090_v31   ;;  %2246 = vst [vmem:[%s2949_s22 + $0xa0] sm:$0xff] %v2170_v32   ;;  %v1254_v39 = vmul.f32 0.1, %v1190_v33  ;;  %v1286_v40 = vmul.f32 0.1, %v1222_v34 }
 0x19d   : > { %v1191_v41 = vadd.f32 %v2932_v19, %v1120_v37  ;;  %v1223_v42 = vadd.f32 %v2932_v19, %v1152_v38 }
 0x19e   : > { %v1318_v51 = vmax.f32 %v1190_v33, %v1254_v39  ;;  %v1350_v52 = vmax.f32 %v1222_v34, %v1286_v40 }
 0x19f   : > { %v1255_v43 = vmul.f32 0.1, %v1191_v41  ;;  %v1287_v44 = vmul.f32 0.1, %v1223_v42  ;;  %v895_v45 = vpop.f32.mrb[24].mxu0  ;;  %v1023_v46 = vpop.f32.mrb[24].mxu1 }
 0x1a0   : > { %v1121_v47 = vmul.f32 %v2927_v17, %v895_v45  ;;  %v1153_v48 = vmul.f32 %v2927_v17, %v1023_v46  ;;  %v897_v49 = vpop.f32.mrb[25].mxu0  ;;  %v1025_v50 = vpop.f32.mrb[25].mxu1 }
 0x1a1   : > { %v1319_v53 = vmax.f32 %v1191_v41, %v1255_v43  ;;  %v1351_v54 = vmax.f32 %v1223_v42, %v1287_v44  ;;  %v898_v55 = vpop.f32.mrb[26].mxu0  ;;  %v1026_v56 = vpop.f32.mrb[26].mxu1 }
 0x1a2   : > { %v1192_v57 = vadd.f32 %v2932_v19, %v1121_v47  ;;  %v1224_v58 = vadd.f32 %v2932_v19, %v1153_v48  ;;  %v1122_v59 = vmul.f32 %v2927_v17, %v898_v55  ;;  %v1154_v60 = vmul.f32 %v2927_v17, %v1026_v56  ;;  %v900_v61 = vpop.f32.mrb[27].mxu0  ;;  %v1028_v62 = vpop.f32.mrb[27].mxu1 }
 0x1a3   : > { %v2095_v63 = vpack.c.bf16 %v1319_v53, %v1318_v51  ;;  %v2175_v0 = vpack.c.bf16 %v1351_v54, %v1350_v52 }
 0x1a4   : > { %v1256_v1 = vmul.f32 0.1, %v1192_v57  ;;  %v1288_v2 = vmul.f32 0.1, %v1224_v58  ;;  %v1193_v3 = vadd.f32 %v2932_v19, %v1122_v59  ;;  %v1225_v4 = vadd.f32 %v2932_v19, %v1154_v60 }
 0x1a5   : > { %2231 = vst [vmem:[%s2949_s22 + $0x28] sm:$0xff] %v2095_v63   ;;  %2247 = vst [vmem:[%s2949_s22 + $0xa8] sm:$0xff] %v2175_v0  }
 0x1a6   : > { %v1257_v5 = vmul.f32 0.1, %v1193_v3  ;;  %v1289_v6 = vmul.f32 0.1, %v1225_v4  ;;  %v1320_v7 = vmax.f32 %v1192_v57, %v1256_v1  ;;  %v1352_v8 = vmax.f32 %v1224_v58, %v1288_v2 }
 0x1a7   : > { %v903_v9 = vpop.f32.mrb[28].mxu0  ;;  %v1031_v10 = vpop.f32.mrb[28].mxu1 }
 0x1a8   : > { %v1321_v11 = vmax.f32 %v1193_v3, %v1257_v5  ;;  %v1353_v12 = vmax.f32 %v1225_v4, %v1289_v6  ;;  %v1123_v13 = vmul.f32 %v2927_v17, %v903_v9  ;;  %v1155_v14 = vmul.f32 %v2927_v17, %v1031_v10  ;;  %v905_v15 = vpop.f32.mrb[29].mxu0  ;;  %v1033_v16 = vpop.f32.mrb[29].mxu1 }
 0x1a9   : > { %v906_v18 = vpop.f32.mrb[30].mxu0  ;;  %v1034_v20 = vpop.f32.mrb[30].mxu1 }
 0x1aa   : > { %v2100_v21 = vpack.c.bf16 %v1321_v11, %v1320_v7  ;;  %v2180_v22 = vpack.c.bf16 %v1353_v12, %v1352_v8  ;;  %v1194_v23 = vadd.f32 %v2932_v19, %v1123_v13  ;;  %v1226_v24 = vadd.f32 %v2932_v19, %v1155_v14  ;;  %v908_v25 = vpop.f32.mrb[31].mxu0  ;;  %v1036_v26 = vpop.f32.mrb[31].mxu1 }
 0x1ab   : > { %v1124_v27 = vmul.f32 %v2927_v17, %v906_v18  ;;  %v1156_v28 = vmul.f32 %v2927_v17, %v1034_v20 }
 0x1ac   : > { %2232 = vst [vmem:[%s2949_s22 + $0x30] sm:$0xff] %v2100_v21   ;;  %2248 = vst [vmem:[%s2949_s22 + $0xb0] sm:$0xff] %v2180_v22   ;;  %v1258_v29 = vmul.f32 0.1, %v1194_v23  ;;  %v1290_v30 = vmul.f32 0.1, %v1226_v24 }
 0x1ad   : > { %v1195_v31 = vadd.f32 %v2932_v19, %v1124_v27  ;;  %v1227_v32 = vadd.f32 %v2932_v19, %v1156_v28 }
 0x1ae   : > { %v1322_v41 = vmax.f32 %v1194_v23, %v1258_v29  ;;  %v1354_v42 = vmax.f32 %v1226_v24, %v1290_v30 }
 0x1af   : > { %v1259_v33 = vmul.f32 0.1, %v1195_v31  ;;  %v1291_v34 = vmul.f32 0.1, %v1227_v32  ;;  %v911_v35 = vpop.f32.mrb[32].mxu0  ;;  %v1039_v36 = vpop.f32.mrb[32].mxu1 }
 0x1b0   : > { %v1125_v37 = vmul.f32 %v2927_v17, %v911_v35  ;;  %v1157_v38 = vmul.f32 %v2927_v17, %v1039_v36  ;;  %v913_v39 = vpop.f32.mrb[33].mxu0  ;;  %v1041_v40 = vpop.f32.mrb[33].mxu1 }
 0x1b1   : > { %v1323_v43 = vmax.f32 %v1195_v31, %v1259_v33  ;;  %v1355_v44 = vmax.f32 %v1227_v32, %v1291_v34  ;;  %v914_v45 = vpop.f32.mrb[34].mxu0  ;;  %v1042_v46 = vpop.f32.mrb[34].mxu1 }
 0x1b2   : > { %v1196_v47 = vadd.f32 %v2932_v19, %v1125_v37  ;;  %v1228_v48 = vadd.f32 %v2932_v19, %v1157_v38  ;;  %v1126_v49 = vmul.f32 %v2927_v17, %v914_v45  ;;  %v1158_v50 = vmul.f32 %v2927_v17, %v1042_v46  ;;  %v916_v51 = vpop.f32.mrb[35].mxu0  ;;  %v1044_v52 = vpop.f32.mrb[35].mxu1 }
 0x1b3   : > { %v2105_v53 = vpack.c.bf16 %v1323_v43, %v1322_v41  ;;  %v2185_v54 = vpack.c.bf16 %v1355_v44, %v1354_v42 }
 0x1b4   : > { %v1260_v55 = vmul.f32 0.1, %v1196_v47  ;;  %v1292_v56 = vmul.f32 0.1, %v1228_v48  ;;  %v1197_v57 = vadd.f32 %v2932_v19, %v1126_v49  ;;  %v1229_v58 = vadd.f32 %v2932_v19, %v1158_v50 }
 0x1b5   : > { %2233 = vst [vmem:[%s2949_s22 + $0x38] sm:$0xff] %v2105_v53   ;;  %2249 = vst [vmem:[%s2949_s22 + $0xb8] sm:$0xff] %v2185_v54  }
 0x1b6   : > { %v1261_v59 = vmul.f32 0.1, %v1197_v57  ;;  %v1293_v60 = vmul.f32 0.1, %v1229_v58  ;;  %v1324_v61 = vmax.f32 %v1196_v47, %v1260_v55  ;;  %v1356_v62 = vmax.f32 %v1228_v48, %v1292_v56 }
 0x1b7   : > { %v919_v63 = vpop.f32.mrb[36].mxu0  ;;  %v1047_v0 = vpop.f32.mrb[36].mxu1 }
 0x1b8   : > { %v1325_v1 = vmax.f32 %v1197_v57, %v1261_v59  ;;  %v1357_v2 = vmax.f32 %v1229_v58, %v1293_v60  ;;  %v1127_v3 = vmul.f32 %v2927_v17, %v919_v63  ;;  %v1159_v4 = vmul.f32 %v2927_v17, %v1047_v0  ;;  %v921_v5 = vpop.f32.mrb[37].mxu0  ;;  %v1049_v6 = vpop.f32.mrb[37].mxu1 }
 0x1b9   : > { %v922_v7 = vpop.f32.mrb[38].mxu0  ;;  %v1050_v8 = vpop.f32.mrb[38].mxu1 }
 0x1ba   : > { %v2110_v9 = vpack.c.bf16 %v1325_v1, %v1324_v61  ;;  %v2190_v10 = vpack.c.bf16 %v1357_v2, %v1356_v62  ;;  %v1198_v11 = vadd.f32 %v2932_v19, %v1127_v3  ;;  %v1230_v12 = vadd.f32 %v2932_v19, %v1159_v4  ;;  %v924_v13 = vpop.f32.mrb[39].mxu0  ;;  %v1052_v14 = vpop.f32.mrb[39].mxu1 }
 0x1bb   : > { %v1128_v15 = vmul.f32 %v2927_v17, %v922_v7  ;;  %v1160_v16 = vmul.f32 %v2927_v17, %v1050_v8 }
 0x1bc   : > { %2234 = vst [vmem:[%s2949_s22 + $0x40] sm:$0xff] %v2110_v9   ;;  %2250 = vst [vmem:[%s2949_s22 + $0xc0] sm:$0xff] %v2190_v10   ;;  %v1262_v18 = vmul.f32 0.1, %v1198_v11  ;;  %v1294_v20 = vmul.f32 0.1, %v1230_v12 }
 0x1bd   : > { %v1199_v21 = vadd.f32 %v2932_v19, %v1128_v15  ;;  %v1231_v22 = vadd.f32 %v2932_v19, %v1160_v16 }
 0x1be   : > { %v1326_v31 = vmax.f32 %v1198_v11, %v1262_v18  ;;  %v1358_v32 = vmax.f32 %v1230_v12, %v1294_v20 }
 0x1bf   : > { %v1263_v23 = vmul.f32 0.1, %v1199_v21  ;;  %v1295_v24 = vmul.f32 0.1, %v1231_v22  ;;  %v927_v25 = vpop.f32.mrb[40].mxu0  ;;  %v1055_v26 = vpop.f32.mrb[40].mxu1 }
 0x1c0   : > { %v1129_v27 = vmul.f32 %v2927_v17, %v927_v25  ;;  %v1161_v28 = vmul.f32 %v2927_v17, %v1055_v26  ;;  %v929_v29 = vpop.f32.mrb[41].mxu0  ;;  %v1057_v30 = vpop.f32.mrb[41].mxu1 }
 0x1c1   : > { %v1327_v33 = vmax.f32 %v1199_v21, %v1263_v23  ;;  %v1359_v34 = vmax.f32 %v1231_v22, %v1295_v24  ;;  %v930_v35 = vpop.f32.mrb[42].mxu0  ;;  %v1058_v36 = vpop.f32.mrb[42].mxu1 }
 0x1c2   : > { %v1200_v37 = vadd.f32 %v2932_v19, %v1129_v27  ;;  %v1232_v38 = vadd.f32 %v2932_v19, %v1161_v28  ;;  %v1130_v39 = vmul.f32 %v2927_v17, %v930_v35  ;;  %v1162_v40 = vmul.f32 %v2927_v17, %v1058_v36  ;;  %v932_v41 = vpop.f32.mrb[43].mxu0  ;;  %v1060_v42 = vpop.f32.mrb[43].mxu1 }
 0x1c3   : > { %v2115_v43 = vpack.c.bf16 %v1327_v33, %v1326_v31  ;;  %v2195_v44 = vpack.c.bf16 %v1359_v34, %v1358_v32 }
 0x1c4   : > { %v1264_v45 = vmul.f32 0.1, %v1200_v37  ;;  %v1296_v46 = vmul.f32 0.1, %v1232_v38  ;;  %v1201_v47 = vadd.f32 %v2932_v19, %v1130_v39  ;;  %v1233_v48 = vadd.f32 %v2932_v19, %v1162_v40 }
 0x1c5   : > { %2235 = vst [vmem:[%s2949_s22 + $0x48] sm:$0xff] %v2115_v43   ;;  %2251 = vst [vmem:[%s2949_s22 + $0xc8] sm:$0xff] %v2195_v44  }
 0x1c6   : > { %v1265_v49 = vmul.f32 0.1, %v1201_v47  ;;  %v1297_v50 = vmul.f32 0.1, %v1233_v48  ;;  %v1328_v51 = vmax.f32 %v1200_v37, %v1264_v45  ;;  %v1360_v52 = vmax.f32 %v1232_v38, %v1296_v46 }
 0x1c7   : > { %v935_v53 = vpop.f32.mrb[44].mxu0  ;;  %v1063_v54 = vpop.f32.mrb[44].mxu1 }
 0x1c8   : > { %v1329_v55 = vmax.f32 %v1201_v47, %v1265_v49  ;;  %v1361_v56 = vmax.f32 %v1233_v48, %v1297_v50  ;;  %v1131_v57 = vmul.f32 %v2927_v17, %v935_v53  ;;  %v1163_v58 = vmul.f32 %v2927_v17, %v1063_v54  ;;  %v937_v59 = vpop.f32.mrb[45].mxu0  ;;  %v1065_v60 = vpop.f32.mrb[45].mxu1 }
 0x1c9   : > { %v938_v61 = vpop.f32.mrb[46].mxu0  ;;  %v1066_v62 = vpop.f32.mrb[46].mxu1 }
 0x1ca   : > { %v2120_v63 = vpack.c.bf16 %v1329_v55, %v1328_v51  ;;  %v2200_v0 = vpack.c.bf16 %v1361_v56, %v1360_v52  ;;  %v1202_v1 = vadd.f32 %v2932_v19, %v1131_v57  ;;  %v1234_v2 = vadd.f32 %v2932_v19, %v1163_v58  ;;  %v940_v3 = vpop.f32.mrb[47].mxu0  ;;  %v1068_v4 = vpop.f32.mrb[47].mxu1 }
 0x1cb   : > { %v1132_v5 = vmul.f32 %v2927_v17, %v938_v61  ;;  %v1164_v6 = vmul.f32 %v2927_v17, %v1066_v62 }
 0x1cc   : > { %2236 = vst [vmem:[%s2949_s22 + $0x50] sm:$0xff] %v2120_v63   ;;  %2252 = vst [vmem:[%s2949_s22 + $0xd0] sm:$0xff] %v2200_v0   ;;  %v1266_v7 = vmul.f32 0.1, %v1202_v1  ;;  %v1298_v8 = vmul.f32 0.1, %v1234_v2 }
 0x1cd   : > { %v1203_v9 = vadd.f32 %v2932_v19, %v1132_v5  ;;  %v1235_v10 = vadd.f32 %v2932_v19, %v1164_v6 }
 0x1ce   : > { %v1330_v21 = vmax.f32 %v1202_v1, %v1266_v7  ;;  %v1362_v22 = vmax.f32 %v1234_v2, %v1298_v8 }
 0x1cf   : > { %v1267_v11 = vmul.f32 0.1, %v1203_v9  ;;  %v1299_v12 = vmul.f32 0.1, %v1235_v10  ;;  %v943_v13 = vpop.f32.mrb[48].mxu0  ;;  %v1071_v14 = vpop.f32.mrb[48].mxu1 }
 0x1d0   : > { %v1133_v15 = vmul.f32 %v2927_v17, %v943_v13  ;;  %v1165_v16 = vmul.f32 %v2927_v17, %v1071_v14  ;;  %v945_v18 = vpop.f32.mrb[49].mxu0  ;;  %v1073_v20 = vpop.f32.mrb[49].mxu1 }
 0x1d1   : > { %v1331_v23 = vmax.f32 %v1203_v9, %v1267_v11  ;;  %v1363_v24 = vmax.f32 %v1235_v10, %v1299_v12  ;;  %v946_v25 = vpop.f32.mrb[50].mxu0  ;;  %v1074_v26 = vpop.f32.mrb[50].mxu1 }
 0x1d2   : > { %v1204_v27 = vadd.f32 %v2932_v19, %v1133_v15  ;;  %v1236_v28 = vadd.f32 %v2932_v19, %v1165_v16  ;;  %v1134_v29 = vmul.f32 %v2927_v17, %v946_v25  ;;  %v1166_v30 = vmul.f32 %v2927_v17, %v1074_v26  ;;  %v948_v31 = vpop.f32.mrb[51].mxu0  ;;  %v1076_v32 = vpop.f32.mrb[51].mxu1 }
 0x1d3   : > { %v2125_v33 = vpack.c.bf16 %v1331_v23, %v1330_v21  ;;  %v2205_v34 = vpack.c.bf16 %v1363_v24, %v1362_v22 }
 0x1d4   : > { %v1268_v35 = vmul.f32 0.1, %v1204_v27  ;;  %v1300_v36 = vmul.f32 0.1, %v1236_v28  ;;  %v1205_v37 = vadd.f32 %v2932_v19, %v1134_v29  ;;  %v1237_v38 = vadd.f32 %v2932_v19, %v1166_v30 }
 0x1d5   : > { %2237 = vst [vmem:[%s2949_s22 + $0x58] sm:$0xff] %v2125_v33   ;;  %2253 = vst [vmem:[%s2949_s22 + $0xd8] sm:$0xff] %v2205_v34  }
 0x1d6   : > { %v1269_v39 = vmul.f32 0.1, %v1205_v37  ;;  %v1301_v40 = vmul.f32 0.1, %v1237_v38  ;;  %v1332_v41 = vmax.f32 %v1204_v27, %v1268_v35  ;;  %v1364_v42 = vmax.f32 %v1236_v28, %v1300_v36 }
 0x1d7   : > { %v951_v43 = vpop.f32.mrb[52].mxu0  ;;  %v1079_v44 = vpop.f32.mrb[52].mxu1 }
 0x1d8   : > { %v1333_v45 = vmax.f32 %v1205_v37, %v1269_v39  ;;  %v1365_v46 = vmax.f32 %v1237_v38, %v1301_v40  ;;  %v1135_v47 = vmul.f32 %v2927_v17, %v951_v43  ;;  %v1167_v48 = vmul.f32 %v2927_v17, %v1079_v44  ;;  %v953_v49 = vpop.f32.mrb[53].mxu0  ;;  %v1081_v50 = vpop.f32.mrb[53].mxu1 }
 0x1d9   : > { %v954_v51 = vpop.f32.mrb[54].mxu0  ;;  %v1082_v52 = vpop.f32.mrb[54].mxu1 }
 0x1da   : > { %v2130_v53 = vpack.c.bf16 %v1333_v45, %v1332_v41  ;;  %v2210_v54 = vpack.c.bf16 %v1365_v46, %v1364_v42  ;;  %v1206_v55 = vadd.f32 %v2932_v19, %v1135_v47  ;;  %v1238_v56 = vadd.f32 %v2932_v19, %v1167_v48  ;;  %v956_v57 = vpop.f32.mrb[55].mxu0  ;;  %v1084_v58 = vpop.f32.mrb[55].mxu1 }
 0x1db   : > { %v1136_v59 = vmul.f32 %v2927_v17, %v954_v51  ;;  %v1168_v60 = vmul.f32 %v2927_v17, %v1082_v52 }
 0x1dc   : > { %2238 = vst [vmem:[%s2949_s22 + $0x60] sm:$0xff] %v2130_v53   ;;  %2254 = vst [vmem:[%s2949_s22 + $0xe0] sm:$0xff] %v2210_v54   ;;  %v1270_v61 = vmul.f32 0.1, %v1206_v55  ;;  %v1302_v62 = vmul.f32 0.1, %v1238_v56 }
 0x1dd   : > { %v1207_v63 = vadd.f32 %v2932_v19, %v1136_v59  ;;  %v1239_v0 = vadd.f32 %v2932_v19, %v1168_v60 }
 0x1de   : > { %v1334_v9 = vmax.f32 %v1206_v55, %v1270_v61  ;;  %v1366_v10 = vmax.f32 %v1238_v56, %v1302_v62 }
 0x1df   : > { %v1271_v1 = vmul.f32 0.1, %v1207_v63  ;;  %v1303_v2 = vmul.f32 0.1, %v1239_v0  ;;  %v959_v3 = vpop.f32.mrb[56].mxu0  ;;  %v1087_v4 = vpop.f32.mrb[56].mxu1 }
 0x1e0   : > { %v1137_v5 = vmul.f32 %v2927_v17, %v959_v3  ;;  %v1169_v6 = vmul.f32 %v2927_v17, %v1087_v4  ;;  %v961_v7 = vpop.f32.mrb[57].mxu0  ;;  %v1089_v8 = vpop.f32.mrb[57].mxu1 }
 0x1e1   : > { %v1335_v11 = vmax.f32 %v1207_v63, %v1271_v1  ;;  %v1367_v12 = vmax.f32 %v1239_v0, %v1303_v2  ;;  %v962_v13 = vpop.f32.mrb[58].mxu0  ;;  %v1090_v14 = vpop.f32.mrb[58].mxu1 }
 0x1e2   : > { %v1208_v15 = vadd.f32 %v2932_v19, %v1137_v5  ;;  %v1240_v16 = vadd.f32 %v2932_v19, %v1169_v6  ;;  %v1138_v18 = vmul.f32 %v2927_v17, %v962_v13  ;;  %v1170_v20 = vmul.f32 %v2927_v17, %v1090_v14  ;;  %v964_v21 = vpop.f32.mrb[59].mxu0  ;;  %v1092_v22 = vpop.f32.mrb[59].mxu1 }
 0x1e3   : > { %v2135_v23 = vpack.c.bf16 %v1335_v11, %v1334_v9  ;;  %v2215_v24 = vpack.c.bf16 %v1367_v12, %v1366_v10 }
 0x1e4   : > { %v1272_v25 = vmul.f32 0.1, %v1208_v15  ;;  %v1304_v26 = vmul.f32 0.1, %v1240_v16  ;;  %v1209_v27 = vadd.f32 %v2932_v19, %v1138_v18  ;;  %v1241_v28 = vadd.f32 %v2932_v19, %v1170_v20 }
 0x1e5   : > { %2239 = vst [vmem:[%s2949_s22 + $0x68] sm:$0xff] %v2135_v23   ;;  %2255 = vst [vmem:[%s2949_s22 + $0xe8] sm:$0xff] %v2215_v24  }
 0x1e6   : > { %v1273_v29 = vmul.f32 0.1, %v1209_v27  ;;  %v1305_v30 = vmul.f32 0.1, %v1241_v28  ;;  %v1336_v31 = vmax.f32 %v1208_v15, %v1272_v25  ;;  %v1368_v32 = vmax.f32 %v1240_v16, %v1304_v26 }
 0x1e7   : > { %v967_v33 = vpop.f32.mrb[60].mxu0  ;;  %v1095_v34 = vpop.f32.mrb[60].mxu1 }
 0x1e8   : > { %v1337_v35 = vmax.f32 %v1209_v27, %v1273_v29  ;;  %v1369_v36 = vmax.f32 %v1241_v28, %v1305_v30  ;;  %v1139_v37 = vmul.f32 %v2927_v17, %v967_v33  ;;  %v1171_v38 = vmul.f32 %v2927_v17, %v1095_v34  ;;  %v969_v39 = vpop.f32.mrb[61].mxu0  ;;  %v1097_v40 = vpop.f32.mrb[61].mxu1 }
 0x1e9   : > { %v970_v41 = vpop.f32.mrb[62].mxu0  ;;  %v1098_v42 = vpop.f32.mrb[62].mxu1 }
 0x1ea   : > { %v2140_v43 = vpack.c.bf16 %v1337_v35, %v1336_v31  ;;  %v2220_v44 = vpack.c.bf16 %v1369_v36, %v1368_v32  ;;  %v1210_v45 = vadd.f32 %v2932_v19, %v1139_v37  ;;  %v1242_v46 = vadd.f32 %v2932_v19, %v1171_v38  ;;  %v972_v47 = vpop.f32.mrb[63].mxu0  ;;  %v1100_v48 = vpop.f32.mrb[63].mxu1 }
 0x1eb   : > { %v1140_v49 = vmul.f32 %v2927_v17, %v970_v41  ;;  %v1172_v50 = vmul.f32 %v2927_v17, %v1098_v42 }
 0x1ec   : > { %2240 = vst [vmem:[%s2949_s22 + $0x70] sm:$0xff] %v2140_v43   ;;  %2256 = vst [vmem:[%s2949_s22 + $0xf0] sm:$0xff] %v2220_v44   ;;  %v1274_v51 = vmul.f32 0.1, %v1210_v45  ;;  %v1306_v52 = vmul.f32 0.1, %v1242_v46 }
 0x1ed   : > { %v1211_v53 = vadd.f32 %v2932_v19, %v1140_v49  ;;  %v1243_v54 = vadd.f32 %v2932_v19, %v1172_v50 }
 0x1ee   : > { %v1338_v57 = vmax.f32 %v1210_v45, %v1274_v51  ;;  %v1370_v58 = vmax.f32 %v1242_v46, %v1306_v52 }
 0x1ef   : > { %v1275_v55 = vmul.f32 0.1, %v1211_v53  ;;  %v1307_v56 = vmul.f32 0.1, %v1243_v54 }
 0x1f1   : > { %v1339_v59 = vmax.f32 %v1211_v53, %v1275_v55  ;;  %v1371_v17 = vmax.f32 %v1243_v54, %v1307_v56 }
 0x1f3   : > { %v2145_v19 = vpack.c.bf16 %v1339_v59, %v1338_v57  ;;  %v2225_v60 = vpack.c.bf16 %v1371_v17, %v1370_v58 }
 0x1f5   : > { %2241 = vst [vmem:[%s2949_s22 + $0x78] sm:$0xff] %v2145_v19   ;;  %2257 = vst [vmem:[%s2949_s22 + $0xf8] sm:$0xff] %v2225_v60  }
 0x1f6   : > { %2553 = shalt.err (!%p2550_p5)
}
 0x1f7   : > { %s2554_s23 = scalar_lea.hbm %s3100_s6, 4096  ;;  %s2558_s14 = scalar_lea.hbm %s3156_s4, 16384 }
 0x1f8   : > { %p2555_p9 = scmp.ne.s32.totalorder %s3100_s6, %s2554_s23  ;;  %p2559_p3 = scmp.lt.u32.totalorder %s3100_s6, %s3156_s4 }
 0x1f9   : > { %p2560_p7 = scmp.lt.u32.totalorder %s2558_s14, %s2554_s23  ;;  %p2562_p4 = scmp.lt.u32.totalorder %s2554_s23, %s3100_s6 }
 0x1fa   : > { %p2556_p1 = pnand %p2555_p9, %p2758_p11 }
 0x1fb   : > { %p2561_p13 = por %p2560_p7, %p2559_p3 }
 0x1fc   : > { %p2557_p2 = pneg %p2556_p1 }
 0x1fd   : > { %p2563_p6 = por %p2562_p4, %p2561_p13 }
 0x1ff   : > { %p2564_p8 = pnand %p2563_p6, %p2557_p2 }
 0x201   : > { %2567 = shalt.err (!%p2564_p8)
}
 0x202   : > { %s2636_s28 = smov 64   ;;  %s2637_s24 = smov 4  }
 0x203   : > { %2296 = dma.vmem_to_hbm [thread:$0]  (%p2758_p11), %s3102_s13, 4096, %s3100_s6, %s1693_s18, %s2636_s28, %s2636_s28, %s2637_s24  }
 0x204 PF: > { %p2313_p12 = scmp.ge.s32.totalorder %s2626_s20, 2  ;;  %s1722_s30 = sand.u32 1, %s2606_s15  }
 0x205   : > { %p3174_p10 = scmp.ne.s32.totalorder %s3164_s26, 0  ;;  %s1723_s9 = scalar_lea.sflag [#allocation4], %s1722_s30 }
 0x207   : > { %p2307_p0 = pnand %p2313_p12, %p3174_p10 }
 0x209   : > { %2601 = dma.done.wait (!%p2307_p0), %s1723_s9, 4096  }
 0x20a   : > { %2603 = vsyncadd (!%p2307_p0), %s1723_s9, 4294963200  ;;  %s21_s20 = sadd.s32 1, %s2626_s20   ;;  %s3175_s15 = smov %s2610_s16 }
 0x20b   : > { %p18_p5 = scmp.ge.s32.totalorder %s21_s20, 6   ;;  %s3176_s16 = smov %s2614_s17 }
 0x20c   : > { %s3177_s17 = smov %s2767_s10  ;;  %s3178_s18 = smov %s2622_s19 }
 0x20d   : > { %s3179_s19 = smov %s3181_s5  ;;  %20 = sbr.rel (!%p18_p5) target bundleno = 7 (0x7), region = 92 }
 0x214   :  { %1728 = vsyncpa [#allocation3], 1 }
 0x215   :  { %1730 = vsyncpa [#allocation3 + $0x1], 1 }
 0x216   :  { %1731 = vsyncpa [#allocation6], 1 }
 0x217   :  { %1732 = vsyncpa [#allocation4], 1 }
 0x218   :  { %1734 = vsyncpa [#allocation4 + $0x1], 1 }

</bundles_post_ra>
